<compile_context>
chip_gen: v7x
topology: tpu7x:2x2x1
jax: 0.10.0
libtpu: 0.0.40
codegen_flags: <defaults>
</compile_context>

<pallas_src>
import functools

import jax
import jax.numpy as jnp
from jax.experimental import pallas as pl
from jax.experimental.pallas import tpu as pltpu


_PAD_MODE = {
    "replicate": "edge",
    "constant": "constant",
    "reflect": "reflect",
    "circular": "wrap",
}


def _round_up(a, b):
    return (a + b - 1) // b * b


def _sublane_pack(dtype):
    # 32-bit dtypes pack 8 rows per sublane tile, 16-bit pack 16, 8-bit pack 32.
    itemsize = jnp.dtype(dtype).itemsize
    return 8 * max(1, 4 // itemsize)


def _make_row_index_map(i, s0, pH, H_orig, clamp_h):
    """H-block size is 1 (squeezed), so the block index equals the row index."""
    if clamp_h:
        # Fold replicate padding along H: padded row h*s0+i maps to original
        # row clamp(h*s0 + i - pH, 0, H-1). Free scalar work in SMEM.
        def index_map(b, h, w):
            r = h * s0 + i - pH
            r = jnp.minimum(jnp.maximum(r, 0), H_orig - 1)
            return (b, r, 0, 0, 0)
    else:
        def index_map(b, h, w):
            return (b, h * s0 + i, 0, 0, 0)
    return index_map


def _unfold3d_kernel(*args, kernel_size, stride, TW, Do, C):
    """Emit one (TW, Do, K*C) output slab using only Ref-window copies."""
    k0, k1, k2 = kernel_size
    _, s1, s2 = stride
    row_refs = args[:k0]          # k0 refs of shape (Wp, Dp, C) (padded rows)
    o_ref = args[k0]              # (TW, Do, K*C) output slab

    w_tile = pl.program_id(2)
    w_base = pl.multiple_of(w_tile * (TW * s1), TW * s1)

    patches = []
    for i in range(k0):
        for j in range(k1):
            for l in range(k2):
                # Ref-window loads: only the (TW, Do, C) window is read; the
                # full padded row is never materialized in vregs.
                if s1 == 1:
                    w_idx = pl.ds(w_base + j, TW)
                else:
                    # TODO(synk): strided (s1>1 / s2>1) windows use strided Ref
                    # loads; this branch is not exercised by __main__ below.
                    w_idx = pl.ds(w_base + j, TW, stride=s1)
                d_idx = pl.ds(l, Do) if s2 == 1 else pl.ds(l, Do, stride=s2)
                patches.append(row_refs[i][w_idx, d_idx, :])

    # Single lane-dense store of the whole slab (instead of K masked partial
    # stores at non-128-aligned lane offsets).
    o_ref[...] = jnp.concatenate(patches, axis=-1)


def _choose_wo_tile(Wo, out_row_bytes, target_bytes=2 << 20):
    """Largest divisor of Wo whose (TW, Do, K*C) block stays <= target."""
    best = 1
    for tw in range(1, Wo + 1):
        if Wo % tw == 0 and tw * out_row_bytes <= target_bytes:
            best = tw
    return best


def _pick_vmem_limit(est_bytes):
    """Generation-aware scoped-VMEM cap (v7x: 64 MiB/TC, v5e/v6e: 128 MiB)."""
    try:
        info = pltpu.get_tpu_info()
        cap = int(getattr(info, "vmem_capacity_bytes", 0)) or (64 << 20)
    except Exception:  # pragma: no cover - fall back to the smallest chip
        cap = 64 << 20
    default_scoped = 16 << 20
    if est_bytes <= default_scoped:
        return None                       # defaults are fine; don't touch it
    want = int(1.25 * est_bytes)          # ~25% headroom for Mosaic scratch
    return int(min(max(want, 32 << 20), int(0.75 * cap)))


def _unfold3d_pallas(xcl, kernel_size, stride, Ho, Wo, Do, *, pH, H_orig, clamp_h):
    """xcl: channels-last input (B, H[,p], Wp, Dp, C) — W/D already padded."""
    B, _, Wp, Dp, C = xcl.shape
    k0, k1, k2 = kernel_size
    s0, s1, s2 = stride
    K = k0 * k1 * k2
    itemsize = jnp.dtype(xcl.dtype).itemsize
    sub = _sublane_pack(xcl.dtype)

    out_row_bytes = _round_up(Do, sub) * _round_up(K * C, 128) * itemsize
    TW = _choose_wo_tile(Wo, out_row_bytes)
    n_w = Wo // TW

    kernel = functools.partial(_unfold3d_kernel, kernel_size=kernel_size,
                               stride=stride, TW=TW, Do=Do, C=C)

    # k0 views of the same array: one prefetched, squeezed H-row per kernel
    # offset i. Their index_maps ignore the w axis, so they are fetched once
    # per (b, h) and reused across all Wo tiles.
    in_specs = [
        pl.BlockSpec((None, None, Wp, Dp, C),
                     _make_row_index_map(i, s0, pH, H_orig, clamp_h))
        for i in range(k0)
    ]
    out_spec = pl.BlockSpec((None, None, TW, Do, K * C),
                            lambda b, h, w: (b, h, w, 0, 0))

    # Double-buffered, tiling-padded VMEM footprint (sublane pack is dtype
    # dependent, lane dim rounds to 128).
    in_blk = Wp * _round_up(Dp, sub) * _round_up(C, 128) * itemsize
    out_blk = TW * out_row_bytes
    est = 2 * (k0 * in_blk + out_blk)
    vmem_limit = _pick_vmem_limit(est)

    return pl.pallas_call(
        kernel,
        out_shape=jax.ShapeDtypeStruct((B, Ho, Wo, Do, K * C), xcl.dtype),
        grid_spec=pltpu.PrefetchScalarGridSpec(
            num_scalar_prefetch=0,
            grid=(B, Ho, n_w),
            in_specs=in_specs,
            out_specs=out_spec,
        ),
        compiler_params=pltpu.CompilerParams(
            dimension_semantics=("parallel", "parallel", "parallel"),
            vmem_limit_bytes=vmem_limit,
        ),
    )(*([xcl] * k0))


def unfold3d(x, kernel_size, stride, padd=(1, 1, 1), padd_mode="replicate"):
    """Forward pass of the PyTorch unfold_3d module. x: (B, C, H, W, D)."""
    assert x.ndim == 5, "expected a 5-D (B, C, H, W, D) input"
    B, C, H, W, D = x.shape
    k0, k1, k2 = kernel_size
    s0, s1, s2 = stride
    # F.pad pads the LAST dim with padd[0], then padd[1], then padd[2].
    pD, pW, pH = padd

    mode = _PAD_MODE[padd_mode]
    clamp_h = (padd_mode == "replicate")
    if clamp_h:
        # H replicate-padding is folded into the kernel's index_map (clamped
        # row index); only W/D are padded in the wrapper.
        xp = jnp.pad(x, ((0, 0), (0, 0), (0, 0), (pW, pW), (pD, pD)), mode=mode)
    else:
        xp = jnp.pad(x, ((0, 0), (0, 0), (pH, pH), (pW, pW), (pD, pD)), mode=mode)

    # Channels-last for the kernel (one extra pass over the small input; the
    # output is K times larger, so this is ~1/K of total HBM traffic).
    xcl = jnp.transpose(xp, (0, 2, 3, 4, 1))          # (B, H[,p], Wp, Dp, C)
    Wp, Dp = xcl.shape[2], xcl.shape[3]
    Hp = H + 2 * pH
    assert Hp >= k0 and Wp >= k1 and Dp >= k2, "kernel larger than padded input"

    Ho = (Hp - k0) // s0 + 1
    Wo = (Wp - k1) // s1 + 1
    Do = (Dp - k2) // s2 + 1
    K = k0 * k1 * k2

    y = _unfold3d_pallas(xcl, (k0, k1, k2), (s0, s1, s2), Ho, Wo, Do,
                         pH=pH if clamp_h else 0,
                         H_orig=H if clamp_h else Hp,
                         clamp_h=clamp_h)
    # (B, Ho, Wo, Do, K*C) -> (B, L, K, C): contiguous, free reshape.
    return y.reshape(B, Ho * Wo * Do, K, C)


class unfold_3d:
    """JAX/Pallas port of the PyTorch unfold_3d module (forward only)."""

    def __init__(self, kernel_size, stride, padd=(1, 1, 1), padd_mode="replicate"):
        if padd_mode not in _PAD_MODE:
            raise NotImplementedError(f"unsupported padd_mode: {padd_mode}")
        self.kernel_size = tuple(int(k) for k in kernel_size)
        self.stride = tuple(int(s) for s in stride)
        self.padd = tuple(int(p) for p in padd)
        self.padd_mode = padd_mode

    def __call__(self, x):
        return unfold3d(x, self.kernel_size, self.stride, self.padd, self.padd_mode)


def _unfold3d_ref(x, kernel_size, stride, padd, padd_mode):
    """Pure-JAX reference matching the PyTorch module."""
    k0, k1, k2 = kernel_size
    s0, s1, s2 = stride
    pD, pW, pH = padd
    xp = jnp.pad(x, ((0, 0), (0, 0), (pH, pH), (pW, pW), (pD, pD)),
                 mode=_PAD_MODE[padd_mode])
    B, C, Hp, Wp, Dp = xp.shape
    Ho = (Hp - k0) // s0 + 1
    Wo = (Wp - k1) // s1 + 1
    Do = (Dp - k2) // s2 + 1
    cols = []
    for i in range(k0):
        for j in range(k1):
            for l in range(k2):
                v = xp[:, :,
                       i:i + (Ho - 1) * s0 + 1:s0,
                       j:j + (Wo - 1) * s1 + 1:s1,
                       l:l + (Do - 1) * s2 + 1:s2]
                cols.append(v)                               # (B, C, Ho, Wo, Do)
    stack = jnp.stack(cols, axis=2)                          # (B, C, K, Ho, Wo, Do)
    out = jnp.transpose(stack, (0, 3, 4, 5, 2, 1))           # (B, Ho, Wo, Do, K, C)
    return out.reshape(B, Ho * Wo * Do, k0 * k1 * k2, C)


if __name__ == "__main__":
    key = jax.random.PRNGKey(0)
    B, C, H, W, D = 2, 4, 8, 8, 8
    x = jax.random.normal(key, (B, C, H, W, D), dtype=jnp.float32)

    configs = [
        dict(kernel_size=(3, 3, 3), stride=(1, 1, 1), padd=(1, 1, 1), padd_mode="replicate"),
        dict(kernel_size=(3, 3, 3), stride=(2, 1, 1), padd=(1, 1, 1), padd_mode="replicate"),
        dict(kernel_size=(3, 3, 3), stride=(1, 1, 1), padd=(1, 1, 1), padd_mode="constant"),
    ]
    for cfg in configs:
        m = unfold_3d(**cfg)
        y = jax.block_until_ready(m(x))
        ref = _unfold3d_ref(x, cfg["kernel_size"], cfg["stride"], cfg["padd"],
                            cfg["padd_mode"])
        assert y.shape == ref.shape, (cfg, y.shape, ref.shape)
        assert jnp.array_equal(y, ref), f"Pallas unfold_3d mismatch for {cfg}"

    # dtype-preserving check (bf16 stays bf16 end-to-end, bitwise exact).
    xb = x.astype(jnp.bfloat16)
    mb = unfold_3d(kernel_size=(3, 3, 3), stride=(1, 1, 1),
                   padd=(1, 1, 1), padd_mode="replicate")
    yb = jax.block_until_ready(mb(xb))
    refb = _unfold3d_ref(xb, (3, 3, 3), (1, 1, 1), (1, 1, 1), "replicate")
    assert yb.dtype == jnp.bfloat16 and yb.shape == refb.shape
    assert jnp.array_equal(yb, refb), "Pallas unfold_3d bf16 mismatch"

    print("KERNEL_OK")
</pallas_src>

<mosaic_0001>
module attributes {stable_mosaic.version = 11 : i64} {
  func.func @_unfold3d_kernel(%arg0: i32, %arg1: i32, %arg2: i32, %arg3: memref<1x1x10x10x4xf32, #tpu.memory_space<vmem>>, %arg4: memref<1x1x10x10x4xf32, #tpu.memory_space<vmem>>, %arg5: memref<1x1x10x10x4xf32, #tpu.memory_space<vmem>>, %arg6: memref<1x1x8x8x108xf32, #tpu.memory_space<vmem>>) attributes {dimension_semantics = [#tpu.dimension_semantics<parallel>, #tpu.dimension_semantics<parallel>, #tpu.dimension_semantics<parallel>], iteration_bounds = array<i64: 2, 8, 1>, scalar_prefetch = 0 : i64, scratch_operands = 0 : i64, tpu.core_type = #tpu.core_type<tc>, window_params = [{transform_indices = @transform_0, window_bounds = array<i64: 1, 1, 10, 10, 4>}, {transform_indices = @transform_1, window_bounds = array<i64: 1, 1, 10, 10, 4>}, {transform_indices = @transform_2, window_bounds = array<i64: 1, 1, 10, 10, 4>}, {transform_indices = @transform_3, window_bounds = array<i64: 1, 1, 8, 8, 108>}]} {
    %c8_i32 = arith.constant 8 : i32
    %0 = arith.muli %arg2, %c8_i32 : i32
    %1 = tpu.assume_multiple %0, 8 : i32
    %c0_i32 = arith.constant 0 : i32
    %2 = arith.addi %1, %c0_i32 : i32
    %c0 = arith.constant 0 : index
    %c0_0 = arith.constant 0 : index
    %3 = arith.index_cast %2 : i32 to index
    %c0_1 = arith.constant 0 : index
    %c0_2 = arith.constant 0 : index
    %4 = vector.load %arg3[%c0, %c0_0, %3, %c0_1, %c0_2] : memref<1x1x10x10x4xf32, #tpu.memory_space<vmem>>, vector<1x1x8x8x4xf32>
    %5 = vector.shape_cast %4 : vector<1x1x8x8x4xf32> to vector<8x8x4xf32>
    %c0_i32_3 = arith.constant 0 : i32
    %6 = arith.addi %1, %c0_i32_3 : i32
    %c0_4 = arith.constant 0 : index
    %c0_5 = arith.constant 0 : index
    %7 = arith.index_cast %6 : i32 to index
    %c1 = arith.constant 1 : index
    %c0_6 = arith.constant 0 : index
    %8 = vector.load %arg3[%c0_4, %c0_5, %7, %c1, %c0_6] : memref<1x1x10x10x4xf32, #tpu.memory_space<vmem>>, vector<1x1x8x8x4xf32>
    %9 = vector.shape_cast %8 : vector<1x1x8x8x4xf32> to vector<8x8x4xf32>
    %c0_i32_7 = arith.constant 0 : i32
    %10 = arith.addi %1, %c0_i32_7 : i32
    %c0_8 = arith.constant 0 : index
    %c0_9 = arith.constant 0 : index
    %11 = arith.index_cast %10 : i32 to index
    %c2 = arith.constant 2 : index
    %c0_10 = arith.constant 0 : index
    %12 = vector.load %arg3[%c0_8, %c0_9, %11, %c2, %c0_10] : memref<1x1x10x10x4xf32, #tpu.memory_space<vmem>>, vector<1x1x8x8x4xf32>
    %13 = vector.shape_cast %12 : vector<1x1x8x8x4xf32> to vector<8x8x4xf32>
    %c1_i32 = arith.constant 1 : i32
    %14 = arith.addi %1, %c1_i32 : i32
    %c0_11 = arith.constant 0 : index
    %c0_12 = arith.constant 0 : index
    %15 = arith.index_cast %14 : i32 to index
    %c0_13 = arith.constant 0 : index
    %c0_14 = arith.constant 0 : index
    %16 = vector.load %arg3[%c0_11, %c0_12, %15, %c0_13, %c0_14] : memref<1x1x10x10x4xf32, #tpu.memory_space<vmem>>, vector<1x1x8x8x4xf32>
    %17 = vector.shape_cast %16 : vector<1x1x8x8x4xf32> to vector<8x8x4xf32>
    %c1_i32_15 = arith.constant 1 : i32
    %18 = arith.addi %1, %c1_i32_15 : i32
    %c0_16 = arith.constant 0 : index
    %c0_17 = arith.constant 0 : index
    %19 = arith.index_cast %18 : i32 to index
    %c1_18 = arith.constant 1 : index
    %c0_19 = arith.constant 0 : index
    %20 = vector.load %arg3[%c0_16, %c0_17, %19, %c1_18, %c0_19] : memref<1x1x10x10x4xf32, #tpu.memory_space<vmem>>, vector<1x1x8x8x4xf32>
    %21 = vector.shape_cast %20 : vector<1x1x8x8x4xf32> to vector<8x8x4xf32>
    %c1_i32_20 = arith.constant 1 : i32
    %22 = arith.addi %1, %c1_i32_20 : i32
    %c0_21 = arith.constant 0 : index
    %c0_22 = arith.constant 0 : index
    %23 = arith.index_cast %22 : i32 to index
    %c2_23 = arith.constant 2 : index
    %c0_24 = arith.constant 0 : index
    %24 = vector.load %arg3[%c0_21, %c0_22, %23, %c2_23, %c0_24] : memref<1x1x10x10x4xf32, #tpu.memory_space<vmem>>, vector<1x1x8x8x4xf32>
    %25 = vector.shape_cast %24 : vector<1x1x8x8x4xf32> to vector<8x8x4xf32>
    %c2_i32 = arith.constant 2 : i32
    %26 = arith.addi %1, %c2_i32 : i32
    %c0_25 = arith.constant 0 : index
    %c0_26 = arith.constant 0 : index
    %27 = arith.index_cast %26 : i32 to index
    %c0_27 = arith.constant 0 : index
    %c0_28 = arith.constant 0 : index
    %28 = vector.load %arg3[%c0_25, %c0_26, %27, %c0_27, %c0_28] : memref<1x1x10x10x4xf32, #tpu.memory_space<vmem>>, vector<1x1x8x8x4xf32>
    %29 = vector.shape_cast %28 : vector<1x1x8x8x4xf32> to vector<8x8x4xf32>
    %c2_i32_29 = arith.constant 2 : i32
    %30 = arith.addi %1, %c2_i32_29 : i32
    %c0_30 = arith.constant 0 : index
    %c0_31 = arith.constant 0 : index
    %31 = arith.index_cast %30 : i32 to index
    %c1_32 = arith.constant 1 : index
    %c0_33 = arith.constant 0 : index
    %32 = vector.load %arg3[%c0_30, %c0_31, %31, %c1_32, %c0_33] : memref<1x1x10x10x4xf32, #tpu.memory_space<vmem>>, vector<1x1x8x8x4xf32>
    %33 = vector.shape_cast %32 : vector<1x1x8x8x4xf32> to vector<8x8x4xf32>
    %c2_i32_34 = arith.constant 2 : i32
    %34 = arith.addi %1, %c2_i32_34 : i32
    %c0_35 = arith.constant 0 : index
    %c0_36 = arith.constant 0 : index
    %35 = arith.index_cast %34 : i32 to index
    %c2_37 = arith.constant 2 : index
    %c0_38 = arith.constant 0 : index
    %36 = vector.load %arg3[%c0_35, %c0_36, %35, %c2_37, %c0_38] : memref<1x1x10x10x4xf32, #tpu.memory_space<vmem>>, vector<1x1x8x8x4xf32>
    %37 = vector.shape_cast %36 : vector<1x1x8x8x4xf32> to vector<8x8x4xf32>
    %c0_i32_39 = arith.constant 0 : i32
    %38 = arith.addi %1, %c0_i32_39 : i32
    %c0_40 = arith.constant 0 : index
    %c0_41 = arith.constant 0 : index
    %39 = arith.index_cast %38 : i32 to index
    %c0_42 = arith.constant 0 : index
    %c0_43 = arith.constant 0 : index
    %40 = vector.load %arg4[%c0_40, %c0_41, %39, %c0_42, %c0_43] : memref<1x1x10x10x4xf32, #tpu.memory_space<vmem>>, vector<1x1x8x8x4xf32>
    %41 = vector.shape_cast %40 : vector<1x1x8x8x4xf32> to vector<8x8x4xf32>
    %c0_i32_44 = arith.constant 0 : i32
    %42 = arith.addi %1, %c0_i32_44 : i32
    %c0_45 = arith.constant 0 : index
    %c0_46 = arith.constant 0 : index
    %43 = arith.index_cast %42 : i32 to index
    %c1_47 = arith.constant 1 : index
    %c0_48 = arith.constant 0 : index
    %44 = vector.load %arg4[%c0_45, %c0_46, %43, %c1_47, %c0_48] : memref<1x1x10x10x4xf32, #tpu.memory_space<vmem>>, vector<1x1x8x8x4xf32>
    %45 = vector.shape_cast %44 : vector<1x1x8x8x4xf32> to vector<8x8x4xf32>
    %c0_i32_49 = arith.constant 0 : i32
    %46 = arith.addi %1, %c0_i32_49 : i32
    %c0_50 = arith.constant 0 : index
    %c0_51 = arith.constant 0 : index
    %47 = arith.index_cast %46 : i32 to index
    %c2_52 = arith.constant 2 : index
    %c0_53 = arith.constant 0 : index
    %48 = vector.load %arg4[%c0_50, %c0_51, %47, %c2_52, %c0_53] : memref<1x1x10x10x4xf32, #tpu.memory_space<vmem>>, vector<1x1x8x8x4xf32>
    %49 = vector.shape_cast %48 : vector<1x1x8x8x4xf32> to vector<8x8x4xf32>
    %c1_i32_54 = arith.constant 1 : i32
    %50 = arith.addi %1, %c1_i32_54 : i32
    %c0_55 = arith.constant 0 : index
    %c0_56 = arith.constant 0 : index
    %51 = arith.index_cast %50 : i32 to index
    %c0_57 = arith.constant 0 : index
    %c0_58 = arith.constant 0 : index
    %52 = vector.load %arg4[%c0_55, %c0_56, %51, %c0_57, %c0_58] : memref<1x1x10x10x4xf32, #tpu.memory_space<vmem>>, vector<1x1x8x8x4xf32>
    %53 = vector.shape_cast %52 : vector<1x1x8x8x4xf32> to vector<8x8x4xf32>
    %c1_i32_59 = arith.constant 1 : i32
    %54 = arith.addi %1, %c1_i32_59 : i32
    %c0_60 = arith.constant 0 : index
    %c0_61 = arith.constant 0 : index
    %55 = arith.index_cast %54 : i32 to index
    %c1_62 = arith.constant 1 : index
    %c0_63 = arith.constant 0 : index
    %56 = vector.load %arg4[%c0_60, %c0_61, %55, %c1_62, %c0_63] : memref<1x1x10x10x4xf32, #tpu.memory_space<vmem>>, vector<1x1x8x8x4xf32>
    %57 = vector.shape_cast %56 : vector<1x1x8x8x4xf32> to vector<8x8x4xf32>
    %c1_i32_64 = arith.constant 1 : i32
    %58 = arith.addi %1, %c1_i32_64 : i32
    %c0_65 = arith.constant 0 : index
    %c0_66 = arith.constant 0 : index
    %59 = arith.index_cast %58 : i32 to index
    %c2_67 = arith.constant 2 : index
    %c0_68 = arith.constant 0 : index
    %60 = vector.load %arg4[%c0_65, %c0_66, %59, %c2_67, %c0_68] : memref<1x1x10x10x4xf32, #tpu.memory_space<vmem>>, vector<1x1x8x8x4xf32>
    %61 = vector.shape_cast %60 : vector<1x1x8x8x4xf32> to vector<8x8x4xf32>
    %c2_i32_69 = arith.constant 2 : i32
    %62 = arith.addi %1, %c2_i32_69 : i32
    %c0_70 = arith.constant 0 : index
    %c0_71 = arith.constant 0 : index
    %63 = arith.index_cast %62 : i32 to index
    %c0_72 = arith.constant 0 : index
    %c0_73 = arith.constant 0 : index
    %64 = vector.load %arg4[%c0_70, %c0_71, %63, %c0_72, %c0_73] : memref<1x1x10x10x4xf32, #tpu.memory_space<vmem>>, vector<1x1x8x8x4xf32>
    %65 = vector.shape_cast %64 : vector<1x1x8x8x4xf32> to vector<8x8x4xf32>
    %c2_i32_74 = arith.constant 2 : i32
    %66 = arith.addi %1, %c2_i32_74 : i32
    %c0_75 = arith.constant 0 : index
    %c0_76 = arith.constant 0 : index
    %67 = arith.index_cast %66 : i32 to index
    %c1_77 = arith.constant 1 : index
    %c0_78 = arith.constant 0 : index
    %68 = vector.load %arg4[%c0_75, %c0_76, %67, %c1_77, %c0_78] : memref<1x1x10x10x4xf32, #tpu.memory_space<vmem>>, vector<1x1x8x8x4xf32>
    %69 = vector.shape_cast %68 : vector<1x1x8x8x4xf32> to vector<8x8x4xf32>
    %c2_i32_79 = arith.constant 2 : i32
    %70 = arith.addi %1, %c2_i32_79 : i32
    %c0_80 = arith.constant 0 : index
    %c0_81 = arith.constant 0 : index
    %71 = arith.index_cast %70 : i32 to index
    %c2_82 = arith.constant 2 : index
    %c0_83 = arith.constant 0 : index
    %72 = vector.load %arg4[%c0_80, %c0_81, %71, %c2_82, %c0_83] : memref<1x1x10x10x4xf32, #tpu.memory_space<vmem>>, vector<1x1x8x8x4xf32>
    %73 = vector.shape_cast %72 : vector<1x1x8x8x4xf32> to vector<8x8x4xf32>
    %c0_i32_84 = arith.constant 0 : i32
    %74 = arith.addi %1, %c0_i32_84 : i32
    %c0_85 = arith.constant 0 : index
    %c0_86 = arith.constant 0 : index
    %75 = arith.index_cast %74 : i32 to index
    %c0_87 = arith.constant 0 : index
    %c0_88 = arith.constant 0 : index
    %76 = vector.load %arg5[%c0_85, %c0_86, %75, %c0_87, %c0_88] : memref<1x1x10x10x4xf32, #tpu.memory_space<vmem>>, vector<1x1x8x8x4xf32>
    %77 = vector.shape_cast %76 : vector<1x1x8x8x4xf32> to vector<8x8x4xf32>
    %c0_i32_89 = arith.constant 0 : i32
    %78 = arith.addi %1, %c0_i32_89 : i32
    %c0_90 = arith.constant 0 : index
    %c0_91 = arith.constant 0 : index
    %79 = arith.index_cast %78 : i32 to index
    %c1_92 = arith.constant 1 : index
    %c0_93 = arith.constant 0 : index
    %80 = vector.load %arg5[%c0_90, %c0_91, %79, %c1_92, %c0_93] : memref<1x1x10x10x4xf32, #tpu.memory_space<vmem>>, vector<1x1x8x8x4xf32>
    %81 = vector.shape_cast %80 : vector<1x1x8x8x4xf32> to vector<8x8x4xf32>
    %c0_i32_94 = arith.constant 0 : i32
    %82 = arith.addi %1, %c0_i32_94 : i32
    %c0_95 = arith.constant 0 : index
    %c0_96 = arith.constant 0 : index
    %83 = arith.index_cast %82 : i32 to index
    %c2_97 = arith.constant 2 : index
    %c0_98 = arith.constant 0 : index
    %84 = vector.load %arg5[%c0_95, %c0_96, %83, %c2_97, %c0_98] : memref<1x1x10x10x4xf32, #tpu.memory_space<vmem>>, vector<1x1x8x8x4xf32>
    %85 = vector.shape_cast %84 : vector<1x1x8x8x4xf32> to vector<8x8x4xf32>
    %c1_i32_99 = arith.constant 1 : i32
    %86 = arith.addi %1, %c1_i32_99 : i32
    %c0_100 = arith.constant 0 : index
    %c0_101 = arith.constant 0 : index
    %87 = arith.index_cast %86 : i32 to index
    %c0_102 = arith.constant 0 : index
    %c0_103 = arith.constant 0 : index
    %88 = vector.load %arg5[%c0_100, %c0_101, %87, %c0_102, %c0_103] : memref<1x1x10x10x4xf32, #tpu.memory_space<vmem>>, vector<1x1x8x8x4xf32>
    %89 = vector.shape_cast %88 : vector<1x1x8x8x4xf32> to vector<8x8x4xf32>
    %c1_i32_104 = arith.constant 1 : i32
    %90 = arith.addi %1, %c1_i32_104 : i32
    %c0_105 = arith.constant 0 : index
    %c0_106 = arith.constant 0 : index
    %91 = arith.index_cast %90 : i32 to index
    %c1_107 = arith.constant 1 : index
    %c0_108 = arith.constant 0 : index
    %92 = vector.load %arg5[%c0_105, %c0_106, %91, %c1_107, %c0_108] : memref<1x1x10x10x4xf32, #tpu.memory_space<vmem>>, vector<1x1x8x8x4xf32>
    %93 = vector.shape_cast %92 : vector<1x1x8x8x4xf32> to vector<8x8x4xf32>
    %c1_i32_109 = arith.constant 1 : i32
    %94 = arith.addi %1, %c1_i32_109 : i32
    %c0_110 = arith.constant 0 : index
    %c0_111 = arith.constant 0 : index
    %95 = arith.index_cast %94 : i32 to index
    %c2_112 = arith.constant 2 : index
    %c0_113 = arith.constant 0 : index
    %96 = vector.load %arg5[%c0_110, %c0_111, %95, %c2_112, %c0_113] : memref<1x1x10x10x4xf32, #tpu.memory_space<vmem>>, vector<1x1x8x8x4xf32>
    %97 = vector.shape_cast %96 : vector<1x1x8x8x4xf32> to vector<8x8x4xf32>
    %c2_i32_114 = arith.constant 2 : i32
    %98 = arith.addi %1, %c2_i32_114 : i32
    %c0_115 = arith.constant 0 : index
    %c0_116 = arith.constant 0 : index
    %99 = arith.index_cast %98 : i32 to index
    %c0_117 = arith.constant 0 : index
    %c0_118 = arith.constant 0 : index
    %100 = vector.load %arg5[%c0_115, %c0_116, %99, %c0_117, %c0_118] : memref<1x1x10x10x4xf32, #tpu.memory_space<vmem>>, vector<1x1x8x8x4xf32>
    %101 = vector.shape_cast %100 : vector<1x1x8x8x4xf32> to vector<8x8x4xf32>
    %c2_i32_119 = arith.constant 2 : i32
    %102 = arith.addi %1, %c2_i32_119 : i32
    %c0_120 = arith.constant 0 : index
    %c0_121 = arith.constant 0 : index
    %103 = arith.index_cast %102 : i32 to index
    %c1_122 = arith.constant 1 : index
    %c0_123 = arith.constant 0 : index
    %104 = vector.load %arg5[%c0_120, %c0_121, %103, %c1_122, %c0_123] : memref<1x1x10x10x4xf32, #tpu.memory_space<vmem>>, vector<1x1x8x8x4xf32>
    %105 = vector.shape_cast %104 : vector<1x1x8x8x4xf32> to vector<8x8x4xf32>
    %c2_i32_124 = arith.constant 2 : i32
    %106 = arith.addi %1, %c2_i32_124 : i32
    %c0_125 = arith.constant 0 : index
    %c0_126 = arith.constant 0 : index
    %107 = arith.index_cast %106 : i32 to index
    %c2_127 = arith.constant 2 : index
    %c0_128 = arith.constant 0 : index
    %108 = vector.load %arg5[%c0_125, %c0_126, %107, %c2_127, %c0_128] : memref<1x1x10x10x4xf32, #tpu.memory_space<vmem>>, vector<1x1x8x8x4xf32>
    %109 = vector.shape_cast %108 : vector<1x1x8x8x4xf32> to vector<8x8x4xf32>
    %110 = tpu.concatenate %5, %9, %13, %17, %21, %25, %29, %33, %37, %41, %45, %49, %53, %57, %61, %65 in 2 : vector<8x8x4xf32>, vector<8x8x4xf32>, vector<8x8x4xf32>, vector<8x8x4xf32>, vector<8x8x4xf32>, vector<8x8x4xf32>, vector<8x8x4xf32>, vector<8x8x4xf32>, vector<8x8x4xf32>, vector<8x8x4xf32>, vector<8x8x4xf32>, vector<8x8x4xf32>, vector<8x8x4xf32>, vector<8x8x4xf32>, vector<8x8x4xf32>, vector<8x8x4xf32> -> vector<8x8x64xf32>
    %111 = tpu.concatenate %69, %73, %77, %81, %85, %89, %93, %97, %101, %105, %109 in 2 : vector<8x8x4xf32>, vector<8x8x4xf32>, vector<8x8x4xf32>, vector<8x8x4xf32>, vector<8x8x4xf32>, vector<8x8x4xf32>, vector<8x8x4xf32>, vector<8x8x4xf32>, vector<8x8x4xf32>, vector<8x8x4xf32>, vector<8x8x4xf32> -> vector<8x8x44xf32>
    %112 = tpu.concatenate %110, %111 in 2 : vector<8x8x64xf32>, vector<8x8x44xf32> -> vector<8x8x108xf32>
    %c0_129 = arith.constant 0 : index
    %c0_130 = arith.constant 0 : index
    %c0_131 = arith.constant 0 : index
    %c0_132 = arith.constant 0 : index
    %c0_133 = arith.constant 0 : index
    %113 = vector.load %arg6[%c0_129, %c0_130, %c0_131, %c0_132, %c0_133] : memref<1x1x8x8x108xf32, #tpu.memory_space<vmem>>, vector<1x1x8x8x108xf32>
    %114 = vector.shape_cast %113 : vector<1x1x8x8x108xf32> to vector<8x8x108xf32>
    %115 = vector.shape_cast %112 : vector<8x8x108xf32> to vector<1x1x8x8x108xf32>
    tpu.vector_store %arg6[%c0_129, %c0_130, %c0_131, %c0_132, %c0_133], %115 {strides = array<i32>} : memref<1x1x8x8x108xf32, #tpu.memory_space<vmem>>, vector<1x1x8x8x108xf32>,
    return
  }
  func.func @transform_0(%arg0: i32, %arg1: i32, %arg2: i32) -> (i32, i32, i32, i32, i32) {
    %c1_i32 = arith.constant 1 : i32
    %0 = arith.muli %arg1, %c1_i32 : i32
    %c0_i32 = arith.constant 0 : i32
    %1 = arith.addi %0, %c0_i32 : i32
    %c1_i32_0 = arith.constant 1 : i32
    %2 = arith.subi %1, %c1_i32_0 : i32
    %c0_i32_1 = arith.constant 0 : i32
    %3 = arith.maxsi %2, %c0_i32_1 : i32
    %c7_i32 = arith.constant 7 : i32
    %4 = arith.minsi %3, %c7_i32 : i32
    %c0_i32_2 = arith.constant 0 : i32
    %c0_i32_3 = arith.constant 0 : i32
    %c0_i32_4 = arith.constant 0 : i32
    %c0_i32_5 = arith.constant 0 : i32
    return %arg0, %4, %c0_i32_2, %c0_i32_3, %c0_i32_4 : i32, i32, i32, i32, i32
  }
  func.func @transform_1(%arg0: i32, %arg1: i32, %arg2: i32) -> (i32, i32, i32, i32, i32) {
    %c1_i32 = arith.constant 1 : i32
    %0 = arith.muli %arg1, %c1_i32 : i32
    %c1_i32_0 = arith.constant 1 : i32
    %1 = arith.addi %0, %c1_i32_0 : i32
    %c1_i32_1 = arith.constant 1 : i32
    %2 = arith.subi %1, %c1_i32_1 : i32
    %c0_i32 = arith.constant 0 : i32
    %3 = arith.maxsi %2, %c0_i32 : i32
    %c7_i32 = arith.constant 7 : i32
    %4 = arith.minsi %3, %c7_i32 : i32
    %c0_i32_2 = arith.constant 0 : i32
    %c0_i32_3 = arith.constant 0 : i32
    %c0_i32_4 = arith.constant 0 : i32
    %c0_i32_5 = arith.constant 0 : i32
    return %arg0, %4, %c0_i32_2, %c0_i32_3, %c0_i32_4 : i32, i32, i32, i32, i32
  }
  func.func @transform_2(%arg0: i32, %arg1: i32, %arg2: i32) -> (i32, i32, i32, i32, i32) {
    %c1_i32 = arith.constant 1 : i32
    %0 = arith.muli %arg1, %c1_i32 : i32
    %c2_i32 = arith.constant 2 : i32
    %1 = arith.addi %0, %c2_i32 : i32
    %c1_i32_0 = arith.constant 1 : i32
    %2 = arith.subi %1, %c1_i32_0 : i32
    %c0_i32 = arith.constant 0 : i32
    %3 = arith.maxsi %2, %c0_i32 : i32
    %c7_i32 = arith.constant 7 : i32
    %4 = arith.minsi %3, %c7_i32 : i32
    %c0_i32_1 = arith.constant 0 : i32
    %c0_i32_2 = arith.constant 0 : i32
    %c0_i32_3 = arith.constant 0 : i32
    %c0_i32_4 = arith.constant 0 : i32
    return %arg0, %4, %c0_i32_1, %c0_i32_2, %c0_i32_3 : i32, i32, i32, i32, i32
  }
  func.func @transform_3(%arg0: i32, %arg1: i32, %arg2: i32) -> (i32, i32, i32, i32, i32) {
    %c0_i32 = arith.constant 0 : i32
    %c0_i32_0 = arith.constant 0 : i32
    %c0_i32_1 = arith.constant 0 : i32
    return %arg0, %arg1, %arg2, %c0_i32, %c0_i32_0 : i32, i32, i32, i32, i32
  }
}

</mosaic_0001>

<bundles_post_ra>
// kernel: tpu_custom_call.1
= control target key start
LH: loop header
LB: loop body
LE: loop exit
PB: predicated region body
PF: predicated region fallthrough
CT: control target
= control target key end

     0   :  { %8 = vsyncpa [#allocation3], 0  ;;  %s3620_s0 = inlined_call_operand.vmem [shape: f32[2,8,10,10,4], index: 0, kind: input, shape index: {}]   ;;  %s3621_s1 = inlined_call_operand.vmem [shape: f32[2,8,10,10,4], index: 1, kind: input, shape index: {}]   ;;  %s3622_s2 = inlined_call_operand.vmem [shape: f32[2,8,10,10,4], index: 2, kind: input, shape index: {}]   ;;  %s3623_s3 = inlined_call_operand.hbm [shape: f32[2,8,8,8,108], index: 3, kind: output, shape index: {}]  }
   0x1   :  { %10 = vsyncpa [#allocation3 + $0x1], 0  ;;  %s2302_s12 = smov 0   ;;  %s2304_s13 = smov 0  }
   0x2   :  { %s2306_s14 = smov 0   ;;  %s2308_s15 = smov 0  }
   0x3   :  { %s2310_s16 = smov 0   ;;  %s2312_s17 = smov 0  }
   0x4   :  { %s2314_s18 = smov 0   ;;  %s2316_s19 = smov 0  }
   0x5 LB: > { %s1849_s20 = sadd.s32 4294967295, %s2262_s19   ;;  %s1850_s21 = sadd.s32 4294967294, %s2262_s19   ;;  %s2262_s19 = sphi %s2316_s19, %s16_s19   ;;  %s2258_s18 = sphi %s2314_s18, %s3812_s18   ;;  %s2254_s17 = sphi %s2312_s17, %s3811_s17   ;;  %s2250_s16 = sphi %s2310_s16, %s3810_s16   ;;  %s2246_s15 = sphi %s2308_s15, %s3809_s15   ;;  %s2242_s14 = sphi %s2306_s14, %s3808_s14   ;;  %s2238_s13 = sphi %s2304_s13, %s3807_s13   ;;  %s2234_s12 = sphi %s2302_s12, %s3806_s12  }
   0x6   : > { %s31_s22 = sadd.s32 1, %s2254_s17  ;;  %s35_s23 = sadd.s32 1, %s2258_s18 }
   0x7   : > { %p33_p0 = scmp.ge.s32.totalorder %s31_s22, 8  ;;  %p168_p1 = scmp.ne.s32.totalorder %s2242_s14, %s2238_s13 }
   0x8   : > { %p169_p2 = scmp.eq.s32.totalorder %s1849_s20, 15  ;;  %p174_p5 = scmp.ne.s32.totalorder %s2238_s13, %s2234_s12 }
   0x9   : > { %s3814_s22 = smov (%p33_p0, %s31_s22), 0  ;;  %s3816_s23 = smov (!%p33_p0, %s35_s23), %s2258_s18 }
   0xa   : > { %s152_s24 = ssub.s32 %s2254_s17, %s3814_s22  ;;  %p2353_p3 = por %p169_p2, %p168_p1 }
   0xb   : > { %p37_p4 = scmp.ge.s32.totalorder %s3816_s23, 2  ;;  %p175_p6 = scmp.eq.s32.totalorder %s1850_s21, 15 }
   0xc   : > { %p1883_p7 = scmp.ge.s32.totalorder %s2262_s19, 1  ;;  %p257_p9 = scmp.lt.s32.totalorder %s2262_s19, 17 }
   0xd   : > { %s3818_s23 = smov (%p37_p4, %s3816_s23), 0  ;;  %p2362_p8 = por %p175_p6, %p174_p5 }
   0xe   : > { %s151_s27 = ssub.s32 %s2258_s18, %s3818_s23  ;;  %s158_s28 = sadd.s32 1, %s2242_s14 }
   0xf   : > { %s153_s29 = sor.u32 %s152_s24, %s151_s27  ;;  %p258_p10 = pnand %p1883_p7, %p257_p9 }
  0x10   : > { %p156_p11 = scmp.eq.s32.totalorder %s153_s29, 0 }
  0x11   : > { %261 = sbr.rel (%p258_p10) target bundleno = 682 (0x2aa), region = 32 }
  0x12   : > { %s2371_s30 = scalar_select %p156_p11, %s2242_s14, %s158_s28  }
  0x18   : > { %s317_s4 = sadd.s32 4294967295, %s2246_s15  ;;  %p322_p12 = scmp.lt.s32.totalorder %s2250_s16, 1  ;;  %vm1084_vm0 = vcmask 31744   ;;  %vm1093_vm1 = vcmask 64512   ;;  %vm1102_vm2 = vcmask 97280   ;;  %vm1111_vm3 = vcmask 130048  }
  0x19   : > { %p318_p13 = scmp.gt.s32.totalorder %s317_s4, 0  ;;  %p1885_p0 = scmp.lt.s32.totalorder %s317_s4, 7  ;;  %vm1120_vm4 = vcmask 162816   ;;  %vm1129_vm5 = vcmask 195584   ;;  %vm1138_vm6 = vcmask 228352   ;;  %vm1147_vm7 = vcmask 261120  }
  0x1a   : > { %s323_s5 = scalar_select %p322_p12, %s2250_s16, 1  ;;  %vm1156_vm8 = vcmask 293888   ;;  %vm1165_vm9 = vcmask 326656   ;;  %vm1174_vm10 = vcmask 359424   ;;  %vm1183_vm11 = vcmask 392192  }
  0x1b   : > { %s3820_s4 = smov (!%p318_p13, %s317_s4), 0  ;;  %s2264_s21 = smov 4   ;;  %vm1192_vm12 = vcmask 424960   ;;  %vm1201_vm13 = vcmask 457728   ;;  %vm1210_vm14 = vcmask 490496   ;;  %vm1651_vm15 = vcmask 523264  }
  0x1c   : > { %s3822_s4 = smov (!%p1885_p0, %s3820_s4), 7  ;;  %s2376_s6 = smul.u32 160, %s323_s5 }
  0x1d   : > { %p324_p1 = scmp.lt.s32.totalorder %s3822_s4, 7  ;;  %s2265_s24 = smov 8  }
  0x1e   : > { %s2266_s27 = smov 12   ;;  %s2267_s28 = smov 16  }
  0x1f   : > { %s3824_s4 = smov (!%p324_p1, %s3822_s4), 7  ;;  %s2268_s29 = smov 20  }
  0x20   : > { %s2071_s7 = smul.u32 20, %s3824_s4  ;;  %s2269_s4 = smov 24  }
  0x21   : > { %p336_p2 = scmp.gt.s32.totalorder %s2246_s15, 0  ;;  %p1891_p4 = scmp.lt.s32.totalorder %s2246_s15, 7 }
  0x22   : > { %s328_s8 = sadd.s32 %s2376_s6, %s2071_s7  ;;  %s3624_s5 = smov 28  }
  0x23   : > { %s1890_s9 = sshll.u32 %s328_s8, 3  ;;  %s3630_s8 = smov 32  }
  0x24   : > { %s2382_s20 = scalar_lea.vmem %s3620_s0, %s1890_s9 }
  0x25   : > { %v2385_v0 = vld [vmem:[%s2382_s20 + $0x21] sm:$0xff]  ;;  %v2392_v2 = vld [vmem:[%s2382_s20 + $0x31] sm:$0xff]  ;;  %s337_s7 = scalar_select %p336_p2, %s2246_s15, 0 }
  0x26   : > { %v384_v1 = vld [vmem:[%s2382_s20 + $0x1] sm:$0xff]  ;;  %616 = vrot.lane.b32.xlu1 %v2385_v0, %s2264_s21  ;;  %v385_v3 = vld [vmem:[%s2382_s20 + $0x11] sm:$0xff] }
  0x27   : > { %612 = vrot.lane.b32.xlu0 %v384_v1, %s2264_s21  ;;  %v2399_v4 = vld [vmem:[%s2382_s20 + $0x51] sm:$0xff]  ;;  %v2402_v5 = vld [vmem:[%s2382_s20 + $0x41] sm:$0xff]  ;;  %s3826_s7 = smov (!%p1891_p4, %s337_s7), 7 }
  0x28   : > { %v2409_v6 = vld [vmem:[%s2382_s20 + $0x71] sm:$0xff]  ;;  %v2412_v7 = vld [vmem:[%s2382_s20 + $0x61] sm:$0xff]  ;;  %p342_p5 = scmp.lt.s32.totalorder %s3826_s7, 7 }
  0x29   : > { %v393_v8 = vld [vmem:[%s2382_s20 + $0x12] sm:$0xff]  ;;  %v392_v9 = vld [vmem:[%s2382_s20 + $0x2] sm:$0xff] }
  0x2a   : > { %618 = vrot.lane.b32.xlu1 %v2392_v2, %s2264_s21  ;;  %v2423_v10 = vld [vmem:[%s2382_s20 + $0x32] sm:$0xff]  ;;  %v2426_v11 = vld [vmem:[%s2382_s20 + $0x22] sm:$0xff]  ;;  %s3828_s7 = smov (!%p342_p5, %s3826_s7), 7 }
  0x2b   : > { %614 = vrot.lane.b32.xlu0 %v385_v3, %s2264_s21  ;;  %v2433_v12 = vld [vmem:[%s2382_s20 + $0x52] sm:$0xff]  ;;  %v2436_v13 = vld [vmem:[%s2382_s20 + $0x42] sm:$0xff]  ;;  %s2073_s9 = smul.u32 20, %s3828_s7  ;;  %s2275_s7 = smov 48  }
  0x2c   : > { %v2443_v14 = vld [vmem:[%s2382_s20 + $0x72] sm:$0xff]  ;;  %v2446_v15 = vld [vmem:[%s2382_s20 + $0x62] sm:$0xff] }
  0x2d   : > { %v1904_v16 = vld [vmem:[%s2382_s20 + $0x20] sm:$0xff]  ;;  %v1903_v17 = vld [vmem:[%s2382_s20 + $0x10] sm:$0xff]  ;;  %s346_s10 = sadd.s32 %s2073_s9, %s2376_s6 }
  0x2e   : > { %622 = vrot.lane.b32.xlu1 %v2399_v4, %s2264_s21  ;;  %v1906_v18 = vld [vmem:[%s2382_s20 + $0x40] sm:$0xff]  ;;  %v1905_v19 = vld [vmem:[%s2382_s20 + $0x30] sm:$0xff]  ;;  %s1896_s11 = sshll.u32 %s346_s10, 3  ;;  %s3626_s10 = smov 40  }
  0x2f   : > { %620 = vrot.lane.b32.xlu0 %v2402_v5, %s2264_s21  ;;  %v2461_v20 = vld [vmem:[%s2382_s20 + $0x60] sm:$0xff]  ;;  %v1907_v21 = vld [vmem:[%s2382_s20 + $0x50] sm:$0xff]  ;;  %s2562_s9 = scalar_lea.vmem %s3621_s1, %s1896_s11  ;;  %s2274_s11 = smov 44  }
  0x30   : > { %v1910_v22 = vld [vmem:[%s2382_s20 + $0x80] sm:$0xff]  ;;  %v2469_v23 = vld [vmem:[%s2382_s20 + $0x70] sm:$0xff] }
  0x31   : > { %v1918_v24 = vld [vmem:[%s2382_s20 + $0x81] sm:$0xff]  ;;  %v1934_v26 = vld [vmem:[%s2382_s20 + $0x90] sm:$0xff] }
  0x32   : > { %626 = vrot.lane.b32.xlu1 %v2409_v6, %s2264_s21  ;;  %v1926_v25 = vld [vmem:[%s2382_s20 + $0x82] sm:$0xff]  ;;  %v1942_v27 = vld [vmem:[%s2382_s20 + $0x91] sm:$0xff] }
  0x33   : > { %624 = vrot.lane.b32.xlu0 %v2412_v7, %s2264_s21  ;;  %v1950_v32 = vld [vmem:[%s2382_s20 + $0x92] sm:$0xff]  ;;  %v455_v36 = vld [vmem:[%s2562_s9] sm:$0xff] }
  0x34   : > { %v2567_v35 = vld [vmem:[%s2562_s9 + $0x10] sm:$0xff]  ;;  %v2581_v40 = vld [vmem:[%s2562_s9 + $0x20] sm:$0xff] }
  0x35   : > { %v2578_v39 = vld [vmem:[%s2562_s9 + $0x30] sm:$0xff]  ;;  %v2595_v44 = vld [vmem:[%s2562_s9 + $0x40] sm:$0xff] }
  0x36   : > { %646 = vrot.lane.b32.xlu1 %v393_v8, %s2265_s24  ;;  %v2592_v43 = vld [vmem:[%s2562_s9 + $0x50] sm:$0xff]  ;;  %v2609_v48 = vld [vmem:[%s2562_s9 + $0x60] sm:$0xff] }
  0x37   : > { %644 = vrot.lane.b32.xlu0 %v392_v9, %s2265_s24  ;;  %v2606_v47 = vld [vmem:[%s2562_s9 + $0x70] sm:$0xff]  ;;  %v463_v52 = vld [vmem:[%s2562_s9 + $0x1] sm:$0xff] }
  0x38   : > { %v2620_v51 = vld [vmem:[%s2562_s9 + $0x11] sm:$0xff]  ;;  %v2634_v56 = vld [vmem:[%s2562_s9 + $0x21] sm:$0xff] }
  0x39   : > { %v2631_v55 = vld [vmem:[%s2562_s9 + $0x31] sm:$0xff]  ;;  %3657 = vst [vmem:[#allocation16_spill] sm:$0xff] %v2634_v56  ;;  %v2648_v60 = vld [vmem:[%s2562_s9 + $0x41] sm:$0xff] }
  0x3a   : > { %650 = vrot.lane.b32.xlu1 %v2423_v10, %s2265_s24  ;;  %3656 = vst [vmem:[#allocation15_spill] sm:$0xff] %v2631_v55  ;;  %v2645_v59 = vld [vmem:[%s2562_s9 + $0x51] sm:$0xff]  ;;  %3660 = vst [vmem:[#allocation19_spill] sm:$0xff] %v2648_v60 }
  0x3b   : > { %648 = vrot.lane.b32.xlu0 %v2426_v11, %s2265_s24  ;;  %3659 = vst [vmem:[#allocation18_spill] sm:$0xff] %v2645_v59  ;;  %v2659_v63 = vld [vmem:[%s2562_s9 + $0x71] sm:$0xff] }
  0x3c   : > { %3663 = vst [vmem:[#allocation22_spill] sm:$0xff] %v2659_v63 }
  0x3e   : > { %654 = vrot.lane.b32.xlu1 %v2433_v12, %s2265_s24 }
  0x3f   : > { %652 = vrot.lane.b32.xlu0 %v2436_v13, %s2265_s24 }
  0x42   : > { %658 = vrot.lane.b32.xlu1 %v2443_v14, %s2265_s24 }
  0x43   : > { %656 = vrot.lane.b32.xlu0 %v2446_v15, %s2265_s24 }
  0x46   : > { %678 = vrot.lane.b32.xlu1 %v1904_v16, %s2266_s27 }
  0x47   : > { %676 = vrot.lane.b32.xlu0 %v1903_v17, %s2266_s27 }
  0x4a   : > { %682 = vrot.lane.b32.xlu1 %v1906_v18, %s2266_s27 }
  0x4b   : > { %680 = vrot.lane.b32.xlu0 %v1905_v19, %s2266_s27 }
  0x4e   : > { %686 = vrot.lane.b32.xlu1 %v2461_v20, %s2266_s27 }
  0x4f   : > { %684 = vrot.lane.b32.xlu0 %v1907_v21, %s2266_s27 }
  0x52   : > { %690 = vrot.lane.b32.xlu1 %v1910_v22, %s2266_s27 }
  0x53   : > { %688 = vrot.lane.b32.xlu0 %v2469_v23, %s2266_s27 }
  0x56   : > { %710 = vrot.lane.b32.xlu1 %v2385_v0, %s2267_s28 }
  0x57   : > { %708 = vrot.lane.b32.xlu0 %v385_v3, %s2267_s28  ;;  %v2673_v3 = vld [vmem:[%s2562_s9 + $0x12] sm:$0xff] }
  0x5a   : > { %714 = vrot.lane.b32.xlu1 %v2402_v5, %s2267_s28 }
  0x5b   : > { %712 = vrot.lane.b32.xlu0 %v2392_v2, %s2267_s28 }
  0x5e   : > { %718 = vrot.lane.b32.xlu1 %v2412_v7, %s2267_s28 }
  0x5f   : > { %716 = vrot.lane.b32.xlu0 %v2399_v4, %s2267_s28 }
  0x62   : > { %722 = vrot.lane.b32.xlu1 %v1918_v24, %s2267_s28 }
  0x63   : > { %720 = vrot.lane.b32.xlu0 %v2409_v6, %s2267_s28 }
  0x66   : > { %742 = vrot.lane.b32.xlu1 %v2426_v11, %s2268_s29 }
  0x67   : > { %740 = vrot.lane.b32.xlu0 %v393_v8, %s2268_s29  ;;  %v2685_v8 = vld [vmem:[%s2562_s9 + $0x22] sm:$0xff] }
  0x6a   : > { %746 = vrot.lane.b32.xlu1 %v2436_v13, %s2268_s29 }
  0x6b   : > { %744 = vrot.lane.b32.xlu0 %v2423_v10, %s2268_s29 }
  0x6e   : > { %750 = vrot.lane.b32.xlu1 %v2446_v15, %s2268_s29 }
  0x6f   : > { %748 = vrot.lane.b32.xlu0 %v2433_v12, %s2268_s29 }
  0x72   : > { %754 = vrot.lane.b32.xlu1 %v1926_v25, %s2268_s29 }
  0x73   : > { %752 = vrot.lane.b32.xlu0 %v2443_v14, %s2268_s29 }
  0x76   : > { %774 = vrot.lane.b32.xlu1 %v1905_v19, %s2269_s4 }
  0x77   : > { %772 = vrot.lane.b32.xlu0 %v1904_v16, %s2269_s4  ;;  %v2709_v16 = vld [vmem:[%s2562_s9 + $0x62] sm:$0xff] }
  0x7a   : > { %778 = vrot.lane.b32.xlu1 %v1907_v21, %s2269_s4 }
  0x7b   : > { %776 = vrot.lane.b32.xlu0 %v1906_v18, %s2269_s4 }
  0x7e   : > { %782 = vrot.lane.b32.xlu1 %v2469_v23, %s2269_s4 }
  0x7f   : > { %780 = vrot.lane.b32.xlu0 %v2461_v20, %s2269_s4 }
  0x82   : > { %786 = vrot.lane.b32.xlu1 %v1934_v26, %s2269_s4 }
  0x83   : > { %784 = vrot.lane.b32.xlu0 %v1910_v22, %s2269_s4 }
  0x86   : > { %806 = vrot.lane.b32.xlu1 %v2392_v2, %s3624_s5 }
  0x87   : > { %804 = vrot.lane.b32.xlu0 %v2385_v0, %s3624_s5  ;;  %v2662_v0 = vld [vmem:[%s2562_s9 + $0x61] sm:$0xff] }
  0x88   : > { %3664 = vst [vmem:[#allocation23_spill] sm:$0xff] %v2662_v0 }
  0x8a   : > { %810 = vrot.lane.b32.xlu1 %v2399_v4, %s3624_s5  ;;  %v471_v4 = vld [vmem:[%s2562_s9 + $0x2] sm:$0xff] }
  0x8b   : > { %808 = vrot.lane.b32.xlu0 %v2402_v5, %s3624_s5 }
  0x8e   : > { %814 = vrot.lane.b32.xlu1 %v2409_v6, %s3624_s5 }
  0x8f   : > { %812 = vrot.lane.b32.xlu0 %v2412_v7, %s3624_s5  ;;  %v2682_v7 = vld [vmem:[%s2562_s9 + $0x32] sm:$0xff] }
  0x92   : > { %818 = vrot.lane.b32.xlu1 %v1942_v27, %s3624_s5  ;;  %v2736_v27 = vld [vmem:[%s2562_s9 + $0x80] sm:$0xff] }
  0x93   : > { %816 = vrot.lane.b32.xlu0 %v1918_v24, %s3624_s5  ;;  %s3628_s5 = smov 36  }
  0x96   : > { %838 = vrot.lane.b32.xlu1 %v2423_v10, %s3630_s8 }
  0x97   : > { %836 = vrot.lane.b32.xlu0 %v2426_v11, %s3630_s8  ;;  %v2694_v11 = vld [vmem:[%s2562_s9 + $0x52] sm:$0xff] }
  0x98   : > { %v2537_v28 = vpop.permute.xlu1 %616 }
  0x99   : > { %3646 = vst [vmem:[#allocation5_spill] sm:$0xff] %v2537_v28  ;;  %v2539_v29 = vpop.permute.xlu0 %612 }
  0x9a   : > { %842 = vrot.lane.b32.xlu1 %v2433_v12, %s3630_s8  ;;  %v2697_v12 = vld [vmem:[%s2562_s9 + $0x42] sm:$0xff] }
  0x9b   : > { %840 = vrot.lane.b32.xlu0 %v2436_v13, %s3630_s8 }
  0x9c   : > { %v2546_v30 = vpop.permute.xlu1 %618 }
  0x9d   : > { %3647 = vst [vmem:[#allocation6_spill] sm:$0xff] %v2546_v30  ;;  %v2548_v31 = vpop.permute.xlu0 %614 }
  0x9e   : > { %3648 = vst [vmem:[#allocation7_spill] sm:$0xff] %v2548_v31  ;;  %846 = vrot.lane.b32.xlu1 %v2443_v14, %s3630_s8 }
  0x9f   : > { %844 = vrot.lane.b32.xlu0 %v2446_v15, %s3630_s8  ;;  %v2706_v15 = vld [vmem:[%s2562_s9 + $0x72] sm:$0xff] }
  0xa0   : > { %v2555_v33 = vpop.permute.xlu1 %622 }
  0xa1   : > { %3649 = vst [vmem:[#allocation8_spill] sm:$0xff] %v2555_v33  ;;  %v2557_v34 = vpop.permute.xlu0 %620 }
  0xa2   : > { %3650 = vst [vmem:[#allocation9_spill] sm:$0xff] %v2557_v34  ;;  %850 = vrot.lane.b32.xlu1 %v1950_v32, %s3630_s8 }
  0xa3   : > { %848 = vrot.lane.b32.xlu0 %v1926_v25, %s3630_s8 }
  0xa4   : > { %v2570_v37 = vpop.permute.xlu1 %626 }
  0xa5   : > { %v2572_v38 = vpop.permute.xlu0 %624 }
  0xa6   : > { %870 = vrot.lane.b32.xlu1 %v2567_v35, %s3628_s5 }
  0xa7   : > { %868 = vrot.lane.b32.xlu0 %v455_v36, %s3628_s5 }
  0xa8   : > { %v2583_v41 = vpop.permute.xlu1 %646 }
  0xa9   : > { %3651 = vst [vmem:[#allocation10_spill] sm:$0xff] %v2583_v41  ;;  %v2585_v42 = vpop.permute.xlu0 %644 }
  0xaa   : > { %874 = vrot.lane.b32.xlu1 %v2578_v39, %s3628_s5 }
  0xab   : > { %872 = vrot.lane.b32.xlu0 %v2581_v40, %s3628_s5 }
  0xac   : > { %v2597_v45 = vpop.permute.xlu1 %650 }
  0xad   : > { %3652 = vst [vmem:[#allocation11_spill] sm:$0xff] %v2597_v45  ;;  %v2599_v46 = vpop.permute.xlu0 %648 }
  0xae   : > { %3653 = vst [vmem:[#allocation12_spill] sm:$0xff] %v2599_v46  ;;  %878 = vrot.lane.b32.xlu1 %v2592_v43, %s3628_s5 }
  0xaf   : > { %876 = vrot.lane.b32.xlu0 %v2595_v44, %s3628_s5 }
  0xb0   : > { %v2611_v49 = vpop.permute.xlu1 %654 }
  0xb1   : > { %3654 = vst [vmem:[#allocation13_spill] sm:$0xff] %v2611_v49  ;;  %v2613_v50 = vpop.permute.xlu0 %652 }
  0xb2   : > { %3655 = vst [vmem:[#allocation14_spill] sm:$0xff] %v2613_v50  ;;  %882 = vrot.lane.b32.xlu1 %v2606_v47, %s3628_s5 }
  0xb3   : > { %880 = vrot.lane.b32.xlu0 %v2609_v48, %s3628_s5  ;;  %s2278_s5 = smov 60  }
  0xb4   : > { %v2623_v53 = vpop.permute.xlu1 %658 }
  0xb5   : > { %v2625_v54 = vpop.permute.xlu0 %656 }
  0xb6   : > { %902 = vrot.lane.b32.xlu1 %v2620_v51, %s3626_s10 }
  0xb7   : > { %900 = vrot.lane.b32.xlu0 %v463_v52, %s3626_s10 }
  0xb8   : > { %v2636_v57 = vpop.permute.xlu1 %678 }
  0xb9   : > { %3658 = vst [vmem:[#allocation17_spill] sm:$0xff] %v2636_v57  ;;  %v2638_v58 = vpop.permute.xlu0 %676 }
  0xba   : > { %906 = vrot.lane.b32.xlu1 %v2631_v55, %s3626_s10 }
  0xbb   : > { %904 = vrot.lane.b32.xlu0 %v2634_v56, %s3626_s10 }
  0xbc   : > { %v2650_v61 = vpop.permute.xlu1 %682 }
  0xbd   : > { %3661 = vst [vmem:[#allocation20_spill] sm:$0xff] %v2650_v61  ;;  %v2652_v62 = vpop.permute.xlu0 %680 }
  0xbe   : > { %3662 = vst [vmem:[#allocation21_spill] sm:$0xff] %v2652_v62  ;;  %910 = vrot.lane.b32.xlu1 %v2645_v59, %s3626_s10 }
  0xbf   : > { %908 = vrot.lane.b32.xlu0 %v2648_v60, %s3626_s10 }
  0xc0   : > { %v2664_v1 = vpop.permute.xlu1 %686 }
  0xc1   : > { %3665 = vst [vmem:[#allocation24_spill] sm:$0xff] %v2664_v1  ;;  %v2666_v2 = vpop.permute.xlu0 %684 }
  0xc2   : > { %3666 = vst [vmem:[#allocation25_spill] sm:$0xff] %v2666_v2  ;;  %914 = vrot.lane.b32.xlu1 %v2659_v63, %s3626_s10 }
  0xc3   : > { %912 = vrot.lane.b32.xlu0 %v2662_v0, %s3626_s10 }
  0xc4   : > { %v2676_v5 = vpop.permute.xlu1 %690 }
  0xc5   : > { %v2678_v6 = vpop.permute.xlu0 %688 }
  0xc6   : > { %934 = vrot.lane.b32.xlu1 %v2673_v3, %s2274_s11 }
  0xc7   : > { %932 = vrot.lane.b32.xlu0 %v471_v4, %s2274_s11 }
  0xc8   : > { %v2687_v9 = vpop.permute.xlu1 %710 }
  0xc9   : > { %3667 = vst [vmem:[#allocation26_spill] sm:$0xff] %v2687_v9  ;;  %v2689_v10 = vpop.permute.xlu0 %708 }
  0xca   : > { %938 = vrot.lane.b32.xlu1 %v2682_v7, %s2274_s11 }
  0xcb   : > { %936 = vrot.lane.b32.xlu0 %v2685_v8, %s2274_s11 }
  0xcc   : > { %v2699_v13 = vpop.permute.xlu1 %714 }
  0xcd   : > { %3668 = vst [vmem:[#allocation27_spill] sm:$0xff] %v2699_v13  ;;  %v2701_v14 = vpop.permute.xlu0 %712 }
  0xce   : > { %3669 = vst [vmem:[#allocation28_spill] sm:$0xff] %v2701_v14  ;;  %942 = vrot.lane.b32.xlu1 %v2694_v11, %s2274_s11 }
  0xcf   : > { %940 = vrot.lane.b32.xlu0 %v2697_v12, %s2274_s11 }
  0xd0   : > { %v2711_v17 = vpop.permute.xlu1 %718 }
  0xd1   : > { %3670 = vst [vmem:[#allocation29_spill] sm:$0xff] %v2711_v17  ;;  %v2713_v18 = vpop.permute.xlu0 %716 }
  0xd2   : > { %3671 = vst [vmem:[#allocation30_spill] sm:$0xff] %v2713_v18  ;;  %946 = vrot.lane.b32.xlu1 %v2706_v15, %s2274_s11 }
  0xd3   : > { %944 = vrot.lane.b32.xlu0 %v2709_v16, %s2274_s11  ;;  %s2276_s11 = smov 52  }
  0xd4   : > { %v2717_v19 = vpop.permute.xlu1 %722 }
  0xd5   : > { %v2719_v21 = vpop.permute.xlu0 %720 }
  0xd6   : > { %966 = vrot.lane.b32.xlu1 %v2581_v40, %s2275_s7 }
  0xd7   : > { %964 = vrot.lane.b32.xlu0 %v2567_v35, %s2275_s7 }
  0xd8   : > { %v2723_v22 = vpop.permute.xlu1 %742 }
  0xd9   : > { %3672 = vst [vmem:[#allocation31_spill] sm:$0xff] %v2723_v22  ;;  %v2725_v24 = vpop.permute.xlu0 %740 }
  0xda   : > { %970 = vrot.lane.b32.xlu1 %v2595_v44, %s2275_s7 }
  0xdb   : > { %968 = vrot.lane.b32.xlu0 %v2578_v39, %s2275_s7 }
  0xdc   : > { %v2729_v25 = vpop.permute.xlu1 %746 }
  0xdd   : > { %3673 = vst [vmem:[#allocation32_spill] sm:$0xff] %v2729_v25  ;;  %v2731_v26 = vpop.permute.xlu0 %744  ;;  %v2763_v25 = vld [vmem:[%s2562_s9 + $0x81] sm:$0xff] }
  0xde   : > { %3674 = vst [vmem:[#allocation33_spill] sm:$0xff] %v2731_v26  ;;  %974 = vrot.lane.b32.xlu1 %v2609_v48, %s2275_s7  ;;  %3680 = vst [vmem:[#allocation39_spill] sm:$0xff] %v2763_v25 }
  0xdf   : > { %972 = vrot.lane.b32.xlu0 %v2592_v43, %s2275_s7 }
  0xe0   : > { %v2738_v32 = vpop.permute.xlu1 %750 }
  0xe1   : > { %3675 = vst [vmem:[#allocation34_spill] sm:$0xff] %v2738_v32  ;;  %v2740_v35 = vpop.permute.xlu0 %748 }
  0xe2   : > { %3676 = vst [vmem:[#allocation35_spill] sm:$0xff] %v2740_v35  ;;  %978 = vrot.lane.b32.xlu1 %v2736_v27, %s2275_s7 }
  0xe3   : > { %976 = vrot.lane.b32.xlu0 %v2606_v47, %s2275_s7  ;;  %s2277_s7 = smov 56  }
  0xe4   : > { %v2744_v36 = vpop.permute.xlu1 %754 }
  0xe5   : > { %v2746_v52 = vpop.permute.xlu0 %752 }
  0xe6   : > { %998 = vrot.lane.b32.xlu1 %v2634_v56, %s2276_s11 }
  0xe7   : > { %996 = vrot.lane.b32.xlu0 %v2620_v51, %s2276_s11 }
  0xe8   : > { %v2750_v4 = vpop.permute.xlu1 %774 }
  0xe9   : > { %3677 = vst [vmem:[#allocation36_spill] sm:$0xff] %v2750_v4  ;;  %v2752_v26 = vpop.permute.xlu0 %772  ;;  %v1974_v4 = vld [vmem:[%s2562_s9 + $0x82] sm:$0xff] }
  0xea   : > { %1002 = vrot.lane.b32.xlu1 %v2648_v60, %s2276_s11 }
  0xeb   : > { %1000 = vrot.lane.b32.xlu0 %v2631_v55, %s2276_s11 }
  0xec   : > { %v2756_v35 = vpop.permute.xlu1 %778 }
  0xed   : > { %3678 = vst [vmem:[#allocation37_spill] sm:$0xff] %v2756_v35  ;;  %v2758_v32 = vpop.permute.xlu0 %776 }
  0xee   : > { %3679 = vst [vmem:[#allocation38_spill] sm:$0xff] %v2758_v32  ;;  %1006 = vrot.lane.b32.xlu1 %v2662_v0, %s2276_s11 }
  0xef   : > { %1004 = vrot.lane.b32.xlu0 %v2645_v59, %s2276_s11 }
  0xf0   : > { %v2765_v18 = vpop.permute.xlu1 %782 }
  0xf1   : > { %3681 = vst [vmem:[#allocation40_spill] sm:$0xff] %v2765_v18  ;;  %v2767_v51 = vpop.permute.xlu0 %780 }
  0xf2   : > { %3682 = vst [vmem:[#allocation41_spill] sm:$0xff] %v2767_v51  ;;  %1010 = vrot.lane.b32.xlu1 %v2763_v25, %s2276_s11 }
  0xf3   : > { %1008 = vrot.lane.b32.xlu0 %v2659_v63, %s2276_s11  ;;  %s353_s11 = sadd.s32 1, %s2246_s15 }
  0xf4   : > { %v2771_v17 = vpop.permute.xlu1 %786  ;;  %p354_p6 = scmp.gt.s32.totalorder %s353_s11, 0  ;;  %p1897_p7 = scmp.lt.s32.totalorder %s353_s11, 7 }
  0xf5   : > { %v2773_v35 = vpop.permute.xlu0 %784 }
  0xf6   : > { %1030 = vrot.lane.b32.xlu1 %v2685_v8, %s2277_s7  ;;  %s355_s10 = scalar_select %p354_p6, %s353_s11, 0 }
  0xf7   : > { %1028 = vrot.lane.b32.xlu0 %v2673_v3, %s2277_s7 }
  0xf8   : > { %v2777_v32 = vpop.permute.xlu1 %806  ;;  %s3830_s10 = smov (!%p1897_p7, %s355_s10), 7 }
  0xf9   : > { %3683 = vst [vmem:[#allocation42_spill] sm:$0xff] %v2777_v32  ;;  %v2779_v18 = vpop.permute.xlu0 %804  ;;  %p360_p9 = scmp.lt.s32.totalorder %s3830_s10, 7 }
  0xfa   : > { %1034 = vrot.lane.b32.xlu1 %v2697_v12, %s2277_s7 }
  0xfb   : > { %1032 = vrot.lane.b32.xlu0 %v2682_v7, %s2277_s7  ;;  %s3832_s10 = smov (!%p360_p9, %s3830_s10), 7 }
  0xfc   : > { %v2783_v51 = vpop.permute.xlu1 %810 }
  0xfd   : > { %3684 = vst [vmem:[#allocation43_spill] sm:$0xff] %v2783_v51  ;;  %v2785_v14 = vpop.permute.xlu0 %808 }
  0xfe   : > { %3685 = vst [vmem:[#allocation44_spill] sm:$0xff] %v2785_v14  ;;  %1038 = vrot.lane.b32.xlu1 %v2709_v16, %s2277_s7 }
  0xff   : > { %1036 = vrot.lane.b32.xlu0 %v2694_v11, %s2277_s7 }
 0x100   : > { %v2791_v13 = vpop.permute.xlu1 %814 }
 0x101   : > { %3686 = vst [vmem:[#allocation45_spill] sm:$0xff] %v2791_v13  ;;  %v2793_v3 = vpop.permute.xlu0 %812 }
 0x102   : > { %3687 = vst [vmem:[#allocation46_spill] sm:$0xff] %v2793_v3  ;;  %1042 = vrot.lane.b32.xlu1 %v1974_v4, %s2277_s7 }
 0x103   : > { %1040 = vrot.lane.b32.xlu0 %v2706_v15, %s2277_s7  ;;  %s2074_s7 = smul.u32 20, %s3832_s10 }
 0x104   : > { %v2796_v32 = vpop.permute.xlu1 %818 }
 0x105   : > { %v2798_v2 = vpop.permute.xlu0 %816 }
 0x106   : > { %1062 = vrot.lane.b32.xlu1 %v2578_v39, %s2278_s5  ;;  %v1982_v39 = vld [vmem:[%s2562_s9 + $0x90] sm:$0xff] }
 0x107   : > { %1060 = vrot.lane.b32.xlu0 %v2581_v40, %s2278_s5 }
 0x108   : > { %v2802_v14 = vpop.permute.xlu1 %838 }
 0x109   : > { %3688 = vst [vmem:[#allocation47_spill] sm:$0xff] %v2802_v14  ;;  %v2804_v13 = vpop.permute.xlu0 %836 }
 0x10a   : > { %1066 = vrot.lane.b32.xlu1 %v2592_v43, %s2278_s5 }
 0x10b   : > { %1064 = vrot.lane.b32.xlu0 %v2595_v44, %s2278_s5 }
 0x10c   : > { %v2808_v3 = vpop.permute.xlu1 %842 }
 0x10d   : > { %3689 = vst [vmem:[#allocation48_spill] sm:$0xff] %v2808_v3  ;;  %v2810_v51 = vpop.permute.xlu0 %840 }
 0x10e   : > { %3690 = vst [vmem:[#allocation49_spill] sm:$0xff] %v2810_v51  ;;  %1070 = vrot.lane.b32.xlu1 %v2606_v47, %s2278_s5 }
 0x10f   : > { %1068 = vrot.lane.b32.xlu0 %v2609_v48, %s2278_s5 }
 0x110   : > { %v2815_v40 = vpop.permute.xlu1 %846 }
 0x111   : > { %3691 = vst [vmem:[#allocation50_spill] sm:$0xff] %v2815_v40  ;;  %v2817_v14 = vpop.permute.xlu0 %844 }
 0x112   : > { %3692 = vst [vmem:[#allocation51_spill] sm:$0xff] %v2817_v14  ;;  %1074 = vrot.lane.b32.xlu1 %v1982_v39, %s2278_s5 }
 0x113   : > { %1072 = vrot.lane.b32.xlu0 %v2736_v27, %s2278_s5  ;;  %s364_s5 = sadd.s32 %s2074_s7, %s2376_s6  ;;  %s2048_s7 = sshll.u32 %s2246_s15, 3 }
 0x114   : > { %v2820_v43 = vpop.permute.xlu1 %850  ;;  %s1902_s11 = sshll.u32 %s364_s5, 3  ;;  %s2049_s5 = sshll.u32 %s2250_s16, 6 }
 0x115   : > { %v2822_v44 = vpop.permute.xlu0 %848  ;;  %s2853_s6 = scalar_lea.vmem %s3622_s2, %s1902_s11  ;;  %s1684_s15 = sadd.s32 %s2049_s5, %s2048_s7 }
 0x116   : > { %1229 = vrot.lane.b32.xlu1 %v2682_v7, %s2264_s21  ;;  %v1998_v7 = vld [vmem:[%s2562_s9 + $0x92] sm:$0xff]  ;;  %v2900_v3 = vld [vmem:[%s2853_s6 + $0x60] sm:$0xff]  ;;  %s2050_s16 = sshll.u32 %s1684_s15, 7 }
 0x117   : > { %1227 = vrot.lane.b32.xlu0 %v2685_v8, %s2264_s21  ;;  %v2897_v51 = vld [vmem:[%s2853_s6 + $0x70] sm:$0xff]  ;;  %3702 = vst [vmem:[#allocation61_spill] sm:$0xff] %v2900_v3  ;;  %v2939_v9 = vld [vmem:[%s2853_s6 + $0x41] sm:$0xff] }
 0x118   : > { %v2828_v47 = vpop.permute.xlu1 %870  ;;  %3701 = vst [vmem:[#allocation60_spill] sm:$0xff] %v2897_v51  ;;  %v2936_v50 = vld [vmem:[%s2853_s6 + $0x51] sm:$0xff]  ;;  %3707 = vst [vmem:[#allocation66_spill] sm:$0xff] %v2939_v9  ;;  %v2953_v46 = vld [vmem:[%s2853_s6 + $0x61] sm:$0xff] }
 0x119   : > { %3693 = vst [vmem:[#allocation52_spill] sm:$0xff] %v2828_v47  ;;  %v2830_v48 = vpop.permute.xlu0 %868  ;;  %v2989_v28 = vld [vmem:[%s2853_s6 + $0x52] sm:$0xff]  ;;  %v2992_v31 = vld [vmem:[%s2853_s6 + $0x42] sm:$0xff] }
 0x11a   : > { %1233 = vrot.lane.b32.xlu1 %v2694_v11, %s2264_s21  ;;  %v2858_v11 = vld [vmem:[%s2853_s6 + $0x10] sm:$0xff]  ;;  %v3006_v0 = vld [vmem:[%s2853_s6 + $0x62] sm:$0xff] }
 0x11b   : > { %1231 = vrot.lane.b32.xlu0 %v2697_v12, %s2264_s21  ;;  %v530_v12 = vld [vmem:[%s2853_s6] sm:$0xff] }
 0x11c   : > { %v2837_v27 = vpop.permute.xlu1 %874 }
 0x11d   : > { %3694 = vst [vmem:[#allocation53_spill] sm:$0xff] %v2837_v27  ;;  %v2839_v39 = vpop.permute.xlu0 %872  ;;  %v2886_v27 = vld [vmem:[%s2853_s6 + $0x40] sm:$0xff] }
 0x11e   : > { %3695 = vst [vmem:[#allocation54_spill] sm:$0xff] %v2839_v39  ;;  %1237 = vrot.lane.b32.xlu1 %v2706_v15, %s2264_s21  ;;  %v2883_v39 = vld [vmem:[%s2853_s6 + $0x50] sm:$0xff] }
 0x11f   : > { %1235 = vrot.lane.b32.xlu0 %v2709_v16, %s2264_s21 }
 0x120   : > { %v2846_v8 = vpop.permute.xlu1 %878 }
 0x121   : > { %3696 = vst [vmem:[#allocation55_spill] sm:$0xff] %v2846_v8  ;;  %v2848_v14 = vpop.permute.xlu0 %876  ;;  %v2872_v8 = vld [vmem:[%s2853_s6 + $0x20] sm:$0xff] }
 0x122   : > { %3697 = vst [vmem:[#allocation56_spill] sm:$0xff] %v2848_v14  ;;  %1241 = vrot.lane.b32.xlu1 %v1998_v7, %s2264_s21  ;;  %v2869_v14 = vld [vmem:[%s2853_s6 + $0x30] sm:$0xff] }
 0x123   : > { %1239 = vrot.lane.b32.xlu0 %v1974_v4, %s2264_s21  ;;  %s3724_s21 = smov 28  }
 0x124   : > { %v2861_v15 = vpop.permute.xlu1 %882 }
 0x125   : > { %v2863_v16 = vpop.permute.xlu0 %880 }
 0x126   : > { %1261 = vrot.lane.b32.xlu1 %v2858_v11, %s2265_s24 }
 0x127   : > { %1259 = vrot.lane.b32.xlu0 %v530_v12, %s2265_s24 }
 0x128   : > { %v2874_v7 = vpop.permute.xlu1 %902 }
 0x129   : > { %3698 = vst [vmem:[#allocation57_spill] sm:$0xff] %v2874_v7  ;;  %v2876_v4 = vpop.permute.xlu0 %900 }
 0x12a   : > { %1265 = vrot.lane.b32.xlu1 %v2869_v14, %s2265_s24 }
 0x12b   : > { %1263 = vrot.lane.b32.xlu0 %v2872_v8, %s2265_s24 }
 0x12c   : > { %v2888_v12 = vpop.permute.xlu1 %906 }
 0x12d   : > { %3699 = vst [vmem:[#allocation58_spill] sm:$0xff] %v2888_v12  ;;  %v2890_v40 = vpop.permute.xlu0 %904  ;;  %v538_v12 = vld [vmem:[%s2853_s6 + $0x1] sm:$0xff] }
 0x12e   : > { %3700 = vst [vmem:[#allocation59_spill] sm:$0xff] %v2890_v40  ;;  %1269 = vrot.lane.b32.xlu1 %v2883_v39, %s2265_s24  ;;  %v2911_v40 = vld [vmem:[%s2853_s6 + $0x11] sm:$0xff] }
 0x12f   : > { %1267 = vrot.lane.b32.xlu0 %v2886_v27, %s2265_s24 }
 0x130   : > { %v2902_v7 = vpop.permute.xlu1 %910 }
 0x131   : > { %3703 = vst [vmem:[#allocation62_spill] sm:$0xff] %v2902_v7  ;;  %v2904_v47 = vpop.permute.xlu0 %908  ;;  %v2925_v7 = vld [vmem:[%s2853_s6 + $0x21] sm:$0xff] }
 0x132   : > { %3704 = vst [vmem:[#allocation63_spill] sm:$0xff] %v2904_v47  ;;  %1273 = vrot.lane.b32.xlu1 %v2897_v51, %s2265_s24  ;;  %v2922_v47 = vld [vmem:[%s2853_s6 + $0x31] sm:$0xff]  ;;  %3705 = vst [vmem:[#allocation64_spill] sm:$0xff] %v2925_v7 }
 0x133   : > { %1271 = vrot.lane.b32.xlu0 %v2900_v3, %s2265_s24 }
 0x134   : > { %v2914_v1 = vpop.permute.xlu1 %914 }
 0x135   : > { %v2916_v22 = vpop.permute.xlu0 %912 }
 0x136   : > { %1293 = vrot.lane.b32.xlu1 %v2911_v40, %s2266_s27 }
 0x137   : > { %1291 = vrot.lane.b32.xlu0 %v538_v12, %s2266_s27 }
 0x138   : > { %v2927_v62 = vpop.permute.xlu1 %934 }
 0x139   : > { %3706 = vst [vmem:[#allocation65_spill] sm:$0xff] %v2927_v62  ;;  %v2929_v61 = vpop.permute.xlu0 %932  ;;  %v2950_v62 = vld [vmem:[%s2853_s6 + $0x71] sm:$0xff] }
 0x13a   : > { %1297 = vrot.lane.b32.xlu1 %v2922_v47, %s2266_s27 }
 0x13b   : > { %1295 = vrot.lane.b32.xlu0 %v2925_v7, %s2266_s27 }
 0x13c   : > { %v2941_v12 = vpop.permute.xlu1 %938 }
 0x13d   : > { %3708 = vst [vmem:[#allocation67_spill] sm:$0xff] %v2941_v12  ;;  %v2943_v49 = vpop.permute.xlu0 %936  ;;  %v546_v12 = vld [vmem:[%s2853_s6 + $0x2] sm:$0xff] }
 0x13e   : > { %3709 = vst [vmem:[#allocation68_spill] sm:$0xff] %v2943_v49  ;;  %1301 = vrot.lane.b32.xlu1 %v2936_v50, %s2266_s27  ;;  %v2964_v49 = vld [vmem:[%s2853_s6 + $0x12] sm:$0xff] }
 0x13f   : > { %1299 = vrot.lane.b32.xlu0 %v2939_v9, %s2266_s27 }
 0x140   : > { %v2955_v45 = vpop.permute.xlu1 %942 }
 0x141   : > { %3710 = vst [vmem:[#allocation69_spill] sm:$0xff] %v2955_v45  ;;  %v2957_v57 = vpop.permute.xlu0 %940  ;;  %v2978_v45 = vld [vmem:[%s2853_s6 + $0x22] sm:$0xff] }
 0x142   : > { %3711 = vst [vmem:[#allocation70_spill] sm:$0xff] %v2957_v57  ;;  %1305 = vrot.lane.b32.xlu1 %v2950_v62, %s2266_s27  ;;  %v2975_v57 = vld [vmem:[%s2853_s6 + $0x32] sm:$0xff] }
 0x143   : > { %1303 = vrot.lane.b32.xlu0 %v2953_v46, %s2266_s27  ;;  %s3725_s27 = smov 32  }
 0x144   : > { %v2967_v34 = vpop.permute.xlu1 %946 }
 0x145   : > { %v2969_v33 = vpop.permute.xlu0 %944 }
 0x146   : > { %1325 = vrot.lane.b32.xlu1 %v2964_v49, %s2267_s28 }
 0x147   : > { %1323 = vrot.lane.b32.xlu0 %v546_v12, %s2267_s28 }
 0x148   : > { %v2980_v30 = vpop.permute.xlu1 %966 }
 0x149   : > { %3712 = vst [vmem:[#allocation71_spill] sm:$0xff] %v2980_v30  ;;  %v2982_v41 = vpop.permute.xlu0 %964  ;;  %v3003_v30 = vld [vmem:[%s2853_s6 + $0x72] sm:$0xff] }
 0x14a   : > { %1329 = vrot.lane.b32.xlu1 %v2975_v57, %s2267_s28 }
 0x14b   : > { %1327 = vrot.lane.b32.xlu0 %v2978_v45, %s2267_s28 }
 0x14c   : > { %v2994_v25 = vpop.permute.xlu1 %970 }
 0x14d   : > { %3713 = vst [vmem:[#allocation72_spill] sm:$0xff] %v2994_v25  ;;  %v2996_v12 = vpop.permute.xlu0 %968 }
 0x14e   : > { %3714 = vst [vmem:[#allocation73_spill] sm:$0xff] %v2996_v12  ;;  %1333 = vrot.lane.b32.xlu1 %v2989_v28, %s2267_s28 }
 0x14f   : > { %1331 = vrot.lane.b32.xlu0 %v2992_v31, %s2267_s28 }
 0x150   : > { %v3008_v63 = vpop.permute.xlu1 %974 }
 0x151   : > { %3715 = vst [vmem:[#allocation74_spill] sm:$0xff] %v3008_v63  ;;  %v3010_v60 = vpop.permute.xlu0 %972 }
 0x152   : > { %3716 = vst [vmem:[#allocation75_spill] sm:$0xff] %v3010_v60  ;;  %1337 = vrot.lane.b32.xlu1 %v3003_v30, %s2267_s28 }
 0x153   : > { %1335 = vrot.lane.b32.xlu0 %v3006_v0, %s2267_s28  ;;  %s3729_s28 = smov 36  }
 0x154   : > { %v3016_v12 = vpop.permute.xlu1 %978 }
 0x155   : > { %v3018_v25 = vpop.permute.xlu0 %976 }
 0x156   : > { %1357 = vrot.lane.b32.xlu1 %v2872_v8, %s2268_s29 }
 0x157   : > { %1355 = vrot.lane.b32.xlu0 %v2858_v11, %s2268_s29  ;;  %v3041_v11 = vld [vmem:[%s2853_s6 + $0x80] sm:$0xff] }
 0x158   : > { %v3024_v63 = vpop.permute.xlu1 %998  ;;  %3720 = vst [vmem:[#allocation79_spill] sm:$0xff] %v3041_v11 }
 0x159   : > { %3717 = vst [vmem:[#allocation76_spill] sm:$0xff] %v3024_v63  ;;  %v3026_v59 = vpop.permute.xlu0 %996 }
 0x15a   : > { %1361 = vrot.lane.b32.xlu1 %v2886_v27, %s2268_s29 }
 0x15b   : > { %1359 = vrot.lane.b32.xlu0 %v2869_v14, %s2268_s29 }
 0x15c   : > { %v3032_v60 = vpop.permute.xlu1 %1002 }
 0x15d   : > { %3718 = vst [vmem:[#allocation77_spill] sm:$0xff] %v3032_v60  ;;  %v3034_v56 = vpop.permute.xlu0 %1000 }
 0x15e   : > { %3719 = vst [vmem:[#allocation78_spill] sm:$0xff] %v3034_v56  ;;  %1365 = vrot.lane.b32.xlu1 %v2900_v3, %s2268_s29 }
 0x15f   : > { %1363 = vrot.lane.b32.xlu0 %v2883_v39, %s2268_s29 }
 0x160   : > { %v3043_v63 = vpop.permute.xlu1 %1006 }
 0x161   : > { %3721 = vst [vmem:[#allocation80_spill] sm:$0xff] %v3043_v63  ;;  %v3045_v55 = vpop.permute.xlu0 %1004  ;;  %v376_v63 = vld [vmem:[%s2382_s20] sm:$0xff] }
 0x162   : > { %3722 = vst [vmem:[#allocation81_spill] sm:$0xff] %v3045_v55  ;;  %1369 = vrot.lane.b32.xlu1 %v3041_v11, %s2268_s29 }
 0x163   : > { %1367 = vrot.lane.b32.xlu0 %v2897_v51, %s2268_s29  ;;  %s3739_s29 = smov 40  }
 0x164   : > { %v3051_v60 = vpop.permute.xlu1 %1010 }
 0x165   : > { %v3053_v56 = vpop.permute.xlu0 %1008 }
 0x166   : > { %1389 = vrot.lane.b32.xlu1 %v2925_v7, %s2269_s4  ;;  %v1085_v7 = vsel %vm1084_vm0, %v376_v63, %v2539_v29 }
 0x167   : > { %1387 = vrot.lane.b32.xlu0 %v2911_v40, %s2269_s4  ;;  %v1094_v40 = vsel %vm1093_vm1, %v1085_v7, %v2585_v42  ;;  %v3085_v42 = vld [vmem:[%s2853_s6 + $0x81] sm:$0xff] }
 0x168   : > { %v3060_v3 = vpop.permute.xlu1 %1030  ;;  %v1103_v51 = vsel %vm1102_vm2, %v1094_v40, %v2638_v58 }
 0x169   : > { %3723 = vst [vmem:[#allocation82_spill] sm:$0xff] %v3060_v3  ;;  %v1029_v55 = vpop.permute.xlu0 %1028 }
 0x16a   : > { %1393 = vrot.lane.b32.xlu1 %v2939_v9, %s2269_s4  ;;  %v1112_v9 = vsel %vm1111_vm3, %v1103_v51, %v2689_v10 }
 0x16b   : > { %1391 = vrot.lane.b32.xlu0 %v2922_v47, %s2269_s4  ;;  %v1121_v29 = vsel %vm1120_vm4, %v1112_v9, %v2725_v24 }
 0x16c   : > { %v3070_v11 = vpop.permute.xlu1 %1034  ;;  %v1130_v58 = vsel %vm1129_vm5, %v1121_v29, %v2752_v26 }
 0x16d   : > { %v3072_v3 = vpop.permute.xlu0 %1032  ;;  %v1139_v51 = vsel %vm1138_vm6, %v1130_v58, %v2779_v18 }
 0x16e   : > { %1397 = vrot.lane.b32.xlu1 %v2953_v46, %s2269_s4  ;;  %v1148_v7 = vsel %vm1147_vm7, %v1139_v51, %v2804_v13 }
 0x16f   : > { %1395 = vrot.lane.b32.xlu0 %v2936_v50, %s2269_s4  ;;  %v1157_v9 = vsel %vm1156_vm8, %v1148_v7, %v2830_v48  ;;  %v1092_v48 = vsel %vm1084_vm0, %v2469_v23, %v2570_v37 }
 0x170   : > { %v3089_v63 = vpop.permute.xlu1 %1038  ;;  %v1166_v24 = vsel %vm1165_vm9, %v1157_v9, %v2876_v4  ;;  %v1091_v4 = vsel %vm1084_vm0, %v2461_v20, %v2572_v38 }
 0x171   : > { %v3091_v10 = vpop.permute.xlu0 %1036  ;;  %v1175_v13 = vsel %vm1174_vm10, %v1166_v24, %v2929_v61  ;;  %v1100_v29 = vsel %vm1093_vm1, %v1091_v4, %v2625_v54  ;;  %v3726_v4 = vld [vmem:[#allocation60_spill] sm:$0xff] }
 0x172   : > { %1401 = vrot.lane.b32.xlu1 %v3085_v42, %s2269_s4  ;;  %v1184_v40 = vsel %vm1183_vm11, %v1175_v13, %v2982_v41  ;;  %v1101_v41 = vsel %vm1093_vm1, %v1092_v48, %v2623_v53  ;;  %v1109_v20 = vsel %vm1102_vm2, %v1100_v29, %v2678_v6 }
 0x173   : > { %1399 = vrot.lane.b32.xlu0 %v2950_v62, %s2269_s4  ;;  %v1193_v61 = vsel %vm1192_vm12, %v1184_v40, %v3026_v59  ;;  %v1110_v23 = vsel %vm1102_vm2, %v1101_v41, %v2676_v5  ;;  %v1118_v53 = vsel %vm1111_vm3, %v1109_v20, %v2719_v21  ;;  %v3732_v20 = vld [vmem:[#allocation16_spill] sm:$0xff]  ;;  %s2279_s4 = smov 64  }
 0x174   : > { %v1043_v18 = vpop.permute.xlu1 %1042  ;;  %v1119_v38 = vsel %vm1111_vm3, %v1110_v23, %v2717_v19 }
 0x175   : > { %v1041_v26 = vpop.permute.xlu0 %1040  ;;  %v1128_v54 = vsel %vm1120_vm4, %v1119_v38, %v2744_v36 }
 0x176   : > { %1421 = vrot.lane.b32.xlu1 %v2978_v45, %s3724_s21  ;;  %v1137_v59 = vsel %vm1129_vm5, %v1128_v54, %v2771_v17 }
 0x177   : > { %1419 = vrot.lane.b32.xlu0 %v2964_v49, %s3724_s21  ;;  %v1202_v49 = vsel %vm1201_vm13, %v1193_v61, %v1029_v55  ;;  %v1127_v55 = vsel %vm1120_vm4, %v1118_v53, %v2746_v52  ;;  %v1146_v21 = vsel %vm1138_vm6, %v1137_v59, %v2796_v32  ;;  %v3727_v61 = vld [vmem:[#allocation61_spill] sm:$0xff] }
 0x178   : > { %v3126_v58 = vpop.permute.xlu1 %1062  ;;  %v1136_v5 = vsel %vm1129_vm5, %v1127_v55, %v2773_v35  ;;  %v1155_v36 = vsel %vm1147_vm7, %v1146_v21, %v2820_v43  ;;  %v3172_v35 = vld [vmem:[%s2853_s6 + $0x82] sm:$0xff] }
 0x179   : > { %v1061_v51 = vpop.permute.xlu0 %1060  ;;  %v1145_v7 = vsel %vm1138_vm6, %v1136_v5, %v2798_v2  ;;  %v1164_v17 = vsel %vm1156_vm8, %v1155_v36, %v2861_v15  ;;  %v3734_v5 = vld [vmem:[#allocation18_spill] sm:$0xff] }
 0x17a   : > { %v3133_v37 = vsel %vm1210_vm14, %v1202_v49, %v1061_v51  ;;  %1425 = vrot.lane.b32.xlu1 %v2992_v31, %s3724_s21  ;;  %v1154_v52 = vsel %vm1147_vm7, %v1145_v7, %v2822_v44  ;;  %v1173_v2 = vsel %vm1165_vm9, %v1164_v17, %v2914_v1  ;;  %v3731_v51 = vld [vmem:[#allocation15_spill] sm:$0xff] }
 0x17b   : > { %1423 = vrot.lane.b32.xlu0 %v2975_v57, %s3724_s21  ;;  %v1163_v32 = vsel %vm1156_vm8, %v1154_v52, %v2863_v16  ;;  %v1182_v24 = vsel %vm1174_vm10, %v1173_v2, %v2967_v34  ;;  %v3735_v7 = vld [vmem:[#allocation19_spill] sm:$0xff] }
 0x17c   : > { %v3151_v6 = vpop.permute.xlu1 %1066  ;;  %v1172_v43 = vsel %vm1165_vm9, %v1163_v32, %v2916_v22  ;;  %v1191_v16 = vsel %vm1183_vm11, %v1182_v24, %v3016_v12 }
 0x17d   : > { %v3153_v19 = vpop.permute.xlu0 %1064  ;;  %v1181_v15 = vsel %vm1174_vm10, %v1172_v43, %v2969_v33  ;;  %v1200_v1 = vsel %vm1192_vm12, %v1191_v16, %v3051_v60  ;;  %v3736_v43 = vld [vmem:[#allocation22_spill] sm:$0xff] }
 0x17e   : > { %1429 = vrot.lane.b32.xlu1 %v3006_v0, %s3724_s21  ;;  %v1190_v13 = vsel %vm1183_vm11, %v1181_v15, %v3018_v25  ;;  %v1209_v33 = vsel %vm1201_vm13, %v1200_v1, %v1043_v18  ;;  %v3737_v15 = vld [vmem:[#allocation23_spill] sm:$0xff] }
 0x17f   : > { %1427 = vrot.lane.b32.xlu0 %v2989_v28, %s3724_s21  ;;  %v1199_v34 = vsel %vm1192_vm12, %v1190_v13, %v3053_v56 }
 0x180   : > { %v3178_v44 = vpop.permute.xlu1 %1070  ;;  %v1208_v22 = vsel %vm1201_vm13, %v1199_v34, %v1041_v26  ;;  %v1990_v34 = vld [vmem:[%s2562_s9 + $0x91] sm:$0xff] }
 0x181   : > { %v3180_v9 = vpop.permute.xlu0 %1068 }
 0x182   : > { %1433 = vrot.lane.b32.xlu1 %v3172_v35, %s3724_s21 }
 0x183   : > { %1431 = vrot.lane.b32.xlu0 %v3003_v30, %s3724_s21  ;;  %s3553_s21 = scalar_lea.hbm %s3623_s3, %s2050_s16 }
 0x184   : > { %v1075_v12 = vpop.permute.xlu1 %1074 }
 0x185   : > { %v1073_v40 = vpop.permute.xlu0 %1072  ;;  %v3201_v25 = vsel %vm1210_vm14, %v1209_v33, %v1075_v12 }
 0x186   : > { %v3204_v48 = vsel %vm1210_vm14, %v1208_v22, %v1073_v40  ;;  %1453 = vrot.lane.b32.xlu1 %v2869_v14, %s3725_s27  ;;  %v2030_v14 = vld [vmem:[%s2853_s6 + $0x90] sm:$0xff] }
 0x187   : > { %1451 = vrot.lane.b32.xlu0 %v2872_v8, %s3725_s27  ;;  %v3728_v8 = vld [vmem:[#allocation79_spill] sm:$0xff] }
 0x188   : > { %v1230_v56 = vpop.permute.xlu1 %1229 }
 0x189   : > { %v1228_v60 = vpop.permute.xlu0 %1227  ;;  %v1540_v23 = vsel %vm1084_vm0, %v3731_v51, %v1230_v56 }
 0x18a   : > { %1457 = vrot.lane.b32.xlu1 %v2883_v39, %s3725_s27  ;;  %v1539_v38 = vsel %vm1084_vm0, %v3732_v20, %v1228_v60 }
 0x18b   : > { %1455 = vrot.lane.b32.xlu0 %v2886_v27, %s3725_s27  ;;  %v3730_v27 = vld [vmem:[#allocation64_spill] sm:$0xff] }
 0x18c   : > { %v1234_v18 = vpop.permute.xlu1 %1233 }
 0x18d   : > { %v1232_v26 = vpop.permute.xlu0 %1231  ;;  %v1542_v21 = vsel %vm1084_vm0, %v3734_v5, %v1234_v18 }
 0x18e   : > { %1461 = vrot.lane.b32.xlu1 %v3726_v4, %s3725_s27  ;;  %v1541_v36 = vsel %vm1084_vm0, %v3735_v7, %v1232_v26 }
 0x18f   : > { %1459 = vrot.lane.b32.xlu0 %v3727_v61, %s3725_s27 }
 0x190   : > { %v1238_v41 = vpop.permute.xlu1 %1237 }
 0x191   : > { %v1236_v29 = vpop.permute.xlu0 %1235  ;;  %v1544_v24 = vsel %vm1084_vm0, %v3736_v43, %v1238_v41 }
 0x192   : > { %1465 = vrot.lane.b32.xlu1 %v2030_v14, %s3725_s27  ;;  %v1543_v16 = vsel %vm1084_vm0, %v3737_v15, %v1236_v29 }
 0x193   : > { %1463 = vrot.lane.b32.xlu0 %v3728_v8, %s3725_s27 }
 0x194   : > { %v1242_v39 = vpop.permute.xlu1 %1241 }
 0x195   : > { %v1240_v49 = vpop.permute.xlu0 %1239 }
 0x196   : > { %1485 = vrot.lane.b32.xlu1 %v2922_v47, %s3729_s28  ;;  %v3733_v47 = vld [vmem:[#allocation66_spill] sm:$0xff] }
 0x197   : > { %1483 = vrot.lane.b32.xlu0 %v3730_v27, %s3729_s28 }
 0x198   : > { %v1262_v53 = vpop.permute.xlu1 %1261 }
 0x199   : > { %v1260_v54 = vpop.permute.xlu0 %1259  ;;  %v1548_v55 = vsel %vm1093_vm1, %v1540_v23, %v1262_v53 }
 0x19a   : > { %v1547_v59 = vsel %vm1093_vm1, %v1539_v38, %v1260_v54  ;;  %1489 = vrot.lane.b32.xlu1 %v2936_v50, %s3729_s28  ;;  %v2038_v50 = vld [vmem:[%s2853_s6 + $0x91] sm:$0xff] }
 0x19b   : > { %1487 = vrot.lane.b32.xlu0 %v3733_v47, %s3729_s28 }
 0x19c   : > { %v1266_v52 = vpop.permute.xlu1 %1265 }
 0x19d   : > { %v1264_v17 = vpop.permute.xlu0 %1263  ;;  %v1550_v32 = vsel %vm1093_vm1, %v1542_v21, %v1266_v52 }
 0x19e   : > { %v1549_v2 = vsel %vm1093_vm1, %v1541_v36, %v1264_v17  ;;  %1493 = vrot.lane.b32.xlu1 %v2950_v62, %s3729_s28  ;;  %v3738_v62 = vld [vmem:[#allocation39_spill] sm:$0xff] }
 0x19f   : > { %1491 = vrot.lane.b32.xlu0 %v2953_v46, %s3729_s28  ;;  %v1546_v46 = vsel %vm1084_vm0, %v1990_v34, %v1242_v39  ;;  %v1545_v12 = vsel %vm1084_vm0, %v3738_v62, %v1240_v49 }
 0x1a0   : > { %v1270_v13 = vpop.permute.xlu1 %1269 }
 0x1a1   : > { %v1268_v1 = vpop.permute.xlu0 %1267  ;;  %v1552_v33 = vsel %vm1093_vm1, %v1544_v24, %v1270_v13 }
 0x1a2   : > { %v1551_v22 = vsel %vm1093_vm1, %v1543_v16, %v1268_v1  ;;  %1497 = vrot.lane.b32.xlu1 %v2038_v50, %s3729_s28 }
 0x1a3   : > { %1495 = vrot.lane.b32.xlu0 %v3085_v42, %s3729_s28 }
 0x1a4   : > { %v1274_v40 = vpop.permute.xlu1 %1273 }
 0x1a5   : > { %v1272_v56 = vpop.permute.xlu0 %1271  ;;  %v1554_v60 = vsel %vm1093_vm1, %v1546_v46, %v1274_v40 }
 0x1a6   : > { %v1553_v18 = vsel %vm1093_vm1, %v1545_v12, %v1272_v56  ;;  %1517 = vrot.lane.b32.xlu1 %v2975_v57, %s3739_s29 }
 0x1a7   : > { %1515 = vrot.lane.b32.xlu0 %v2978_v45, %s3739_s29  ;;  %v2046_v45 = vld [vmem:[%s2853_s6 + $0x92] sm:$0xff] }
 0x1a8   : > { %v1294_v26 = vpop.permute.xlu1 %1293 }
 0x1a9   : > { %v1292_v42 = vpop.permute.xlu0 %1291  ;;  %v1556_v4 = vsel %vm1102_vm2, %v1548_v55, %v1294_v26 }
 0x1aa   : > { %v1555_v61 = vsel %vm1102_vm2, %v1547_v59, %v1292_v42  ;;  %1521 = vrot.lane.b32.xlu1 %v2989_v28, %s3739_s29 }
 0x1ab   : > { %1519 = vrot.lane.b32.xlu0 %v2992_v31, %s3739_s29 }
 0x1ac   : > { %v1298_v14 = vpop.permute.xlu1 %1297 }
 0x1ad   : > { %v1296_v41 = vpop.permute.xlu0 %1295  ;;  %v1558_v29 = vsel %vm1102_vm2, %v1550_v32, %v1298_v14 }
 0x1ae   : > { %v1557_v57 = vsel %vm1102_vm2, %v1549_v2, %v1296_v41  ;;  %1525 = vrot.lane.b32.xlu1 %v3003_v30, %s3739_s29 }
 0x1af   : > { %1523 = vrot.lane.b32.xlu0 %v3006_v0, %s3739_s29 }
 0x1b0   : > { %v1302_v8 = vpop.permute.xlu1 %1301 }
 0x1b1   : > { %v1300_v39 = vpop.permute.xlu0 %1299  ;;  %v1560_v28 = vsel %vm1102_vm2, %v1552_v33, %v1302_v8 }
 0x1b2   : > { %v1559_v49 = vsel %vm1102_vm2, %v1551_v22, %v1300_v39  ;;  %1529 = vrot.lane.b32.xlu1 %v2046_v45, %s3739_s29 }
 0x1b3   : > { %1527 = vrot.lane.b32.xlu0 %v3172_v35, %s3739_s29  ;;  %s2280_s29 = smov [#allocation2]  }
 0x1b4   : > { %v1306_v31 = vpop.permute.xlu1 %1305 }
 0x1b5   : > { %v1304_v27 = vpop.permute.xlu0 %1303  ;;  %v1562_v51 = vsel %vm1102_vm2, %v1554_v60, %v1306_v31 }
 0x1b6   : > { %v1561_v30 = vsel %vm1102_vm2, %v1553_v18, %v1304_v27 }
 0x1b8   : > { %v1326_v23 = vpop.permute.xlu1 %1325 }
 0x1b9   : > { %v1324_v0 = vpop.permute.xlu0 %1323  ;;  %v1564_v20 = vsel %vm1111_vm3, %v1556_v4, %v1326_v23 }
 0x1ba   : > { %v1563_v38 = vsel %vm1111_vm3, %v1555_v61, %v1324_v0 }
 0x1bc   : > { %v1330_v53 = vpop.permute.xlu1 %1329 }
 0x1bd   : > { %v1328_v54 = vpop.permute.xlu0 %1327  ;;  %v1566_v55 = vsel %vm1111_vm3, %v1558_v29, %v1330_v53 }
 0x1be   : > { %v1565_v59 = vsel %vm1111_vm3, %v1557_v57, %v1328_v54 }
 0x1c0   : > { %v1334_v47 = vpop.permute.xlu1 %1333 }
 0x1c1   : > { %v1332_v35 = vpop.permute.xlu0 %1331  ;;  %v1568_v5 = vsel %vm1111_vm3, %v1560_v28, %v1334_v47 }
 0x1c2   : > { %v1567_v21 = vsel %vm1111_vm3, %v1559_v49, %v1332_v35 }
 0x1c4   : > { %v1338_v7 = vpop.permute.xlu1 %1337 }
 0x1c5   : > { %v1336_v36 = vpop.permute.xlu0 %1335  ;;  %v1570_v52 = vsel %vm1111_vm3, %v1562_v51, %v1338_v7 }
 0x1c6   : > { %v1569_v17 = vsel %vm1111_vm3, %v1561_v30, %v1336_v36 }
 0x1c8   : > { %v1358_v32 = vpop.permute.xlu1 %1357 }
 0x1c9   : > { %v1356_v2 = vpop.permute.xlu0 %1355  ;;  %v1572_v50 = vsel %vm1120_vm4, %v1564_v20, %v1358_v32 }
 0x1ca   : > { %v1571_v43 = vsel %vm1120_vm4, %v1563_v38, %v1356_v2 }
 0x1cc   : > { %v1362_v24 = vpop.permute.xlu1 %1361 }
 0x1cd   : > { %v1360_v15 = vpop.permute.xlu0 %1359  ;;  %v1574_v16 = vsel %vm1120_vm4, %v1566_v55, %v1362_v24 }
 0x1ce   : > { %v1573_v13 = vsel %vm1120_vm4, %v1565_v59, %v1360_v15 }
 0x1d0   : > { %v1366_v1 = vpop.permute.xlu1 %1365 }
 0x1d1   : > { %v1364_v34 = vpop.permute.xlu0 %1363  ;;  %v3299_v33 = vsel %vm1120_vm4, %v1568_v5, %v1366_v1 }
 0x1d2   : > { %v3302_v22 = vsel %vm1120_vm4, %v1567_v21, %v1364_v34 }
 0x1d4   : > { %v1370_v46 = vpop.permute.xlu1 %1369 }
 0x1d5   : > { %v1368_v62 = vpop.permute.xlu0 %1367  ;;  %v3305_v12 = vsel %vm1120_vm4, %v1570_v52, %v1370_v46 }
 0x1d6   : > { %v3308_v40 = vsel %vm1120_vm4, %v1569_v17, %v1368_v62 }
 0x1d8   : > { %v1390_v56 = vpop.permute.xlu1 %1389 }
 0x1d9   : > { %v1388_v60 = vpop.permute.xlu0 %1387  ;;  %v1580_v7 = vsel %vm1129_vm5, %v1572_v50, %v1390_v56 }
 0x1da   : > { %v1579_v36 = vsel %vm1129_vm5, %v1571_v43, %v1388_v60 }
 0x1dc   : > { %v1394_v18 = vpop.permute.xlu1 %1393 }
 0x1dd   : > { %v1392_v26 = vpop.permute.xlu0 %1391  ;;  %v1582_v46 = vsel %vm1129_vm5, %v1574_v16, %v1394_v18 }
 0x1de   : > { %v1581_v50 = vsel %vm1129_vm5, %v1573_v13, %v1392_v26 }
 0x1e0   : > { %v1398_v42 = vpop.permute.xlu1 %1397 }
 0x1e1   : > { %v1396_v4 = vpop.permute.xlu0 %1395 }
 0x1e4   : > { %v3310_v61 = vpop.permute.xlu1 %1401 }
 0x1e5   : > { %v3312_v14 = vpop.permute.xlu0 %1399 }
 0x1e8   : > { %v1422_v41 = vpop.permute.xlu1 %1421 }
 0x1e9   : > { %v1420_v29 = vpop.permute.xlu0 %1419  ;;  %v1588_v52 = vsel %vm1138_vm6, %v1580_v7, %v1422_v41  ;;  %v2163_v7 = vld [vmem:[%s2382_s20 + $0x10] sm:$0xff] }
 0x1ea   : > { %v1587_v17 = vsel %vm1138_vm6, %v1579_v36, %v1420_v29  ;;  %v2164_v36 = vld [vmem:[%s2382_s20 + $0x20] sm:$0xff] }
 0x1ec   : > { %v1426_v57 = vpop.permute.xlu1 %1425 }
 0x1ed   : > { %v1424_v45 = vpop.permute.xlu0 %1423  ;;  %v1590_v56 = vsel %vm1138_vm6, %v1582_v46, %v1426_v57  ;;  %v1584_v57 = vsel %vm1129_vm5, %v3299_v33, %v1398_v42  ;;  %v2167_v46 = vld [vmem:[%s2382_s20 + $0x40] sm:$0xff] }
 0x1ee   : > { %v1589_v60 = vsel %vm1138_vm6, %v1581_v50, %v1424_v45  ;;  %v1583_v45 = vsel %vm1129_vm5, %v3302_v22, %v1396_v4  ;;  %v3745_v50 = vld [vmem:[#allocation9_spill] sm:$0xff] }
 0x1f0   : > { %v1430_v8 = vpop.permute.xlu1 %1429 }
 0x1f1   : > { %v1428_v39 = vpop.permute.xlu0 %1427 }
 0x1f4   : > { %v1434_v28 = vpop.permute.xlu1 %1433 }
 0x1f5   : > { %v1432_v49 = vpop.permute.xlu0 %1431 }
 0x1f8   : > { %v1454_v31 = vpop.permute.xlu1 %1453 }
 0x1f9   : > { %v1452_v27 = vpop.permute.xlu0 %1451  ;;  %v1596_v32 = vsel %vm1147_vm7, %v1588_v52, %v1454_v31  ;;  %v3741_v52 = vld [vmem:[#allocation5_spill] sm:$0xff] }
 0x1fa   : > { %v1595_v2 = vsel %vm1147_vm7, %v1587_v17, %v1452_v27 }
 0x1fc   : > { %v1458_v51 = vpop.permute.xlu1 %1457 }
 0x1fd   : > { %v1456_v30 = vpop.permute.xlu0 %1455  ;;  %v1598_v41 = vsel %vm1147_vm7, %v1590_v56, %v1458_v51  ;;  %v1592_v51 = vsel %vm1138_vm6, %v1584_v57, %v1430_v8  ;;  %v1586_v8 = vsel %vm1129_vm5, %v3305_v12, %v3310_v61 }
 0x1fe   : > { %v1597_v29 = vsel %vm1147_vm7, %v1589_v60, %v1456_v30  ;;  %v1591_v30 = vsel %vm1138_vm6, %v1583_v45, %v1428_v39  ;;  %v1585_v39 = vsel %vm1129_vm5, %v3308_v40, %v3312_v14  ;;  %v3747_v60 = vld [vmem:[#allocation11_spill] sm:$0xff]  ;;  %v3751_v45 = vld [vmem:[#allocation14_spill] sm:$0xff] }
 0x200   : > { %v1462_v23 = vpop.permute.xlu1 %1461 }
 0x201   : > { %v1460_v0 = vpop.permute.xlu0 %1459 }
 0x204   : > { %v1466_v20 = vpop.permute.xlu1 %1465 }
 0x205   : > { %v1464_v38 = vpop.permute.xlu0 %1463 }
 0x208   : > { %v1486_v53 = vpop.permute.xlu1 %1485 }
 0x209   : > { %v1484_v54 = vpop.permute.xlu0 %1483  ;;  %v1604_v24 = vsel %vm1156_vm8, %v1596_v32, %v1486_v53  ;;  %v1600_v53 = vsel %vm1147_vm7, %v1592_v51, %v1462_v23  ;;  %v2165_v32 = vld [vmem:[%s2382_s20 + $0x30] sm:$0xff] }
 0x20a   : > { %v1603_v15 = vsel %vm1156_vm8, %v1595_v2, %v1484_v54  ;;  %v1599_v54 = vsel %vm1147_vm7, %v1591_v30, %v1460_v0  ;;  %v1594_v0 = vsel %vm1138_vm6, %v1586_v8, %v1434_v28  ;;  %v3743_v2 = vld [vmem:[#allocation6_spill] sm:$0xff]  ;;  %v3753_v30 = vld [vmem:[#allocation21_spill] sm:$0xff] }
 0x20b   : > { %v1602_v12 = vsel %vm1147_vm7, %v1594_v0, %v1466_v20  ;;  %v3740_v20 = vld [vmem:[#allocation7_spill] sm:$0xff] }
 0x20c   : > { %v1490_v55 = vpop.permute.xlu1 %1489 }
 0x20d   : > { %v1488_v59 = vpop.permute.xlu0 %1487  ;;  %v1606_v16 = vsel %vm1156_vm8, %v1598_v41, %v1490_v55 }
 0x20e   : > { %v1605_v13 = vsel %vm1156_vm8, %v1597_v29, %v1488_v59  ;;  %v1593_v59 = vsel %vm1138_vm6, %v1585_v39, %v1432_v49  ;;  %v3748_v29 = vld [vmem:[#allocation12_spill] sm:$0xff]  ;;  %v3757_v39 = vld [vmem:[#allocation27_spill] sm:$0xff] }
 0x20f   : > { %v1601_v61 = vsel %vm1147_vm7, %v1593_v59, %v1464_v38  ;;  %v1086_v38 = vsel %vm1084_vm0, %v2163_v7, %v3740_v20  ;;  %v3759_v59 = vld [vmem:[#allocation28_spill] sm:$0xff]  ;;  %v3764_v20 = vld [vmem:[#allocation33_spill] sm:$0xff] }
 0x210   : > { %v1494_v47 = vpop.permute.xlu1 %1493 }
 0x211   : > { %v1492_v35 = vpop.permute.xlu0 %1491  ;;  %v1608_v33 = vsel %vm1156_vm8, %v1600_v53, %v1494_v47 }
 0x212   : > { %v1607_v22 = vsel %vm1156_vm8, %v1599_v54, %v1492_v35  ;;  %v3754_v54 = vld [vmem:[#allocation31_spill] sm:$0xff] }
 0x214   : > { %v1498_v5 = vpop.permute.xlu1 %1497 }
 0x215   : > { %v1496_v21 = vpop.permute.xlu0 %1495  ;;  %v1610_v40 = vsel %vm1156_vm8, %v1602_v12, %v1498_v5  ;;  %v1087_v5 = vsel %vm1084_vm0, %v2164_v36, %v3741_v52  ;;  %v3765_v36 = vld [vmem:[#allocation34_spill] sm:$0xff] }
 0x216   : > { %v1609_v14 = vsel %vm1156_vm8, %v1601_v61, %v1496_v21  ;;  %v3742_v21 = vld [vmem:[#allocation10_spill] sm:$0xff]  ;;  %v3760_v61 = vld [vmem:[#allocation29_spill] sm:$0xff] }
 0x217   : > { %v1095_v17 = vsel %vm1093_vm1, %v1086_v38, %v3742_v21 }
 0x218   : > { %v1518_v1 = vpop.permute.xlu1 %1517 }
 0x219   : > { %v1516_v34 = vpop.permute.xlu0 %1515  ;;  %v1612_v43 = vsel %vm1165_vm9, %v1604_v24, %v1518_v1  ;;  %v1088_v24 = vsel %vm1084_vm0, %v2165_v32, %v3743_v2  ;;  %v3744_v1 = vld [vmem:[#allocation8_spill] sm:$0xff]  ;;  %v3768_v2 = vld [vmem:[#allocation37_spill] sm:$0xff] }
 0x21a   : > { %v1611_v62 = vsel %vm1165_vm9, %v1603_v15, %v1516_v34  ;;  %1629 = vrot.lane.b32.xlu1 %v1612_v43, %s2279_s4  ;;  %v2166_v15 = vld [vmem:[%s2382_s20 + $0x50] sm:$0xff]  ;;  %v1089_v43 = vsel %vm1084_vm0, %v2167_v46, %v3745_v50  ;;  %v1097_v41 = vsel %vm1093_vm1, %v1088_v24, %v3747_v60  ;;  %s314_s20 = sand.u32 1, %s2238_s13   ;;  %v3771_v50 = vld [vmem:[#allocation40_spill] sm:$0xff] }
 0x21b   : > { %1627 = vrot.lane.b32.xlu0 %v1611_v62, %s2279_s4  ;;  %v1090_v34 = vsel %vm1084_vm0, %v2166_v15, %v3744_v1  ;;  %v3746_v62 = vld [vmem:[#allocation17_spill] sm:$0xff]  ;;  %v3769_v15 = vld [vmem:[#allocation38_spill] sm:$0xff]  ;;  %v3773_v60 = vld [vmem:[#allocation43_spill] sm:$0xff]  ;;  %s1884_s8 = sshll.u32 %s314_s20, 6  ;;  %vm1660_vm0 = vcmask 883712   ;;  %s3567_s27 = scalar_lea.sflag [#allocation3], %s314_s20 }
 0x21c   : > { %v1522_v18 = vpop.permute.xlu1 %1521  ;;  %v1104_v56 = vsel %vm1102_vm2, %v1095_v17, %v3746_v62  ;;  %v3767_v17 = vld [vmem:[#allocation35_spill] sm:$0xff]  ;;  %v3772_v62 = vld [vmem:[#allocation41_spill] sm:$0xff]  ;;  %s3497_s9 = scalar_lea.vmem [#allocation2], %s1884_s8 }
 0x21d   : > { %v1520_v26 = vpop.permute.xlu0 %1519  ;;  %v1614_v31 = vsel %vm1165_vm9, %v1606_v16, %v1522_v18  ;;  %v1096_v16 = vsel %vm1093_vm1, %v1087_v5, %v3748_v29  ;;  %v3766_v5 = vld [vmem:[#allocation47_spill] sm:$0xff]  ;;  %v3774_v29 = vld [vmem:[#allocation57_spill] sm:$0xff]  ;;  %s1687_s11 = sshll.u32 %s3497_s9, 4  ;;  %s3555_s11 = int_to_ptr.vmem [resolvable:$true] %s1687_s11 }
 0x21e   : > { %v1613_v27 = vsel %vm1165_vm9, %v1605_v13, %v1520_v26  ;;  %1633 = vrot.lane.b32.xlu1 %v1614_v31, %s2279_s4  ;;  %v3749_v13 = vld [vmem:[#allocation13_spill] sm:$0xff]  ;;  %v3750_v26 = vld [vmem:[#allocation26_spill] sm:$0xff]  ;;  %v1098_v31 = vsel %vm1093_vm1, %v1089_v43, %v3751_v45  ;;  %v1105_v53 = vsel %vm1102_vm2, %v1096_v16, %v3753_v30  ;;  %v3779_v30 = vld [vmem:[#allocation48_spill] sm:$0xff]  ;;  %s2168_s28 = scalar_lea.vmem %s3555_s11, 1024 }
 0x21f   : > { %1631 = vrot.lane.b32.xlu0 %v1613_v27, %s2279_s4  ;;  %v1099_v18 = vsel %vm1093_vm1, %v1090_v34, %v3749_v13  ;;  %v1113_v57 = vsel %vm1111_vm3, %v1104_v56, %v3750_v26  ;;  %v3752_v27 = vld [vmem:[#allocation20_spill] sm:$0xff]  ;;  %v1114_v12 = vsel %vm1111_vm3, %v1105_v53, %v3759_v59  ;;  %v3776_v26 = vld [vmem:[#allocation45_spill] sm:$0xff]  ;;  %v3777_v45 = vld [vmem:[#allocation46_spill] sm:$0xff]  ;;  %p2169_p10 = scmp.ne.s32.totalorder %s3555_s11, %s2168_s28 }
 0x220   : > { %v1526_v42 = vpop.permute.xlu1 %1525  ;;  %v1106_v51 = vsel %vm1102_vm2, %v1097_v41, %v3752_v27  ;;  %v1123_v38 = vsel %vm1120_vm4, %v1114_v12, %v3764_v20  ;;  %v3770_v34 = vld [vmem:[#allocation52_spill] sm:$0xff]  ;;  %v3778_v27 = vld [vmem:[#allocation65_spill] sm:$0xff]  ;;  %v3790_v20 = vld [vmem:[#allocation67_spill] sm:$0xff] }
 0x221   : > { %v1524_v4 = vpop.permute.xlu0 %1523  ;;  %v1616_v55 = vsel %vm1165_vm9, %v1608_v33, %v1526_v42  ;;  %v1122_v33 = vsel %vm1120_vm4, %v1113_v57, %v3754_v54  ;;  %v1132_v1 = vsel %vm1129_vm5, %v1123_v38, %v3769_v15  ;;  %v3775_v13 = vld [vmem:[#allocation44_spill] sm:$0xff]  ;;  %v3780_v54 = vld [vmem:[#allocation49_spill] sm:$0xff]  ;;  %p2170_p11 = pnand %p2169_p10, %p2353_p3 }
 0x222   : > { %v1615_v23 = vsel %vm1165_vm9, %v1607_v22, %v1524_v4  ;;  %1637 = vrot.lane.b32.xlu1 %v1616_v55, %s2279_s4  ;;  %v3755_v22 = vld [vmem:[#allocation24_spill] sm:$0xff]  ;;  %v3756_v4 = vld [vmem:[#allocation25_spill] sm:$0xff]  ;;  %v1115_v55 = vsel %vm1111_vm3, %v1106_v51, %v3757_v39 }
 0x223   : > { %1635 = vrot.lane.b32.xlu0 %v1615_v23, %s2279_s4  ;;  %v1108_v42 = vsel %vm1102_vm2, %v1099_v18, %v3755_v22  ;;  %v1107_v8 = vsel %vm1102_vm2, %v1098_v31, %v3756_v4  ;;  %v3758_v23 = vld [vmem:[#allocation36_spill] sm:$0xff]  ;;  %v1141_v18 = vsel %vm1138_vm6, %v1132_v1, %v3775_v13  ;;  %v3781_v22 = vld [vmem:[#allocation50_spill] sm:$0xff]  ;;  %v3782_v4 = vld [vmem:[#allocation71_spill] sm:$0xff]  ;;  %p2171_p12 = pneg %p2170_p11 }
 0x224   : > { %v1530_v47 = vpop.permute.xlu1 %1529  ;;  %v1131_v0 = vsel %vm1129_vm5, %v1122_v33, %v3758_v23  ;;  %v1150_v33 = vsel %vm1147_vm7, %v1141_v18, %v3780_v54  ;;  %v3783_v39 = vld [vmem:[#allocation53_spill] sm:$0xff]  ;;  %v3784_v23 = vld [vmem:[#allocation54_spill] sm:$0xff]  ;;  %v3785_v59 = vld [vmem:[#allocation76_spill] sm:$0xff] }
 0x225   : > { %v1528_v28 = vpop.permute.xlu0 %1527  ;;  %v1618_v35 = vsel %vm1165_vm9, %v1610_v40, %v1530_v47  ;;  %v1117_v40 = vsel %vm1111_vm3, %v1108_v42, %v3760_v61  ;;  %v3786_v61 = vld [vmem:[#allocation58_spill] sm:$0xff] }
 0x226   : > { %v1617_v49 = vsel %vm1165_vm9, %v1609_v14, %v1528_v28  ;;  %1641 = vrot.lane.b32.xlu1 %v1618_v35, %s2279_s4  ;;  %v3761_v14 = vld [vmem:[#allocation30_spill] sm:$0xff]  ;;  %v1126_v52 = vsel %vm1120_vm4, %v1117_v40, %v3765_v36  ;;  %v3791_v36 = vld [vmem:[#allocation68_spill] sm:$0xff] }
 0x227   : > { %1639 = vrot.lane.b32.xlu0 %v1617_v49, %s2279_s4  ;;  %v1116_v47 = vsel %vm1111_vm3, %v1107_v8, %v3761_v14  ;;  %v3762_v28 = vld [vmem:[#allocation42_spill] sm:$0xff]  ;;  %v3763_v49 = vld [vmem:[#allocation32_spill] sm:$0xff]  ;;  %v1135_v43 = vsel %vm1129_vm5, %v1126_v52, %v3771_v50  ;;  %v3787_v14 = vld [vmem:[#allocation59_spill] sm:$0xff]  ;;  %s2172_s4 = sshll.u32 %s2280_s29, 4  ;;  %s2173_s4 = int_to_ptr.vmem [resolvable:$false] %s2172_s4 }
 0x228   : > { %v1140_v35 = vsel %vm1138_vm6, %v1131_v0, %v3762_v28  ;;  %v1124_v7 = vsel %vm1120_vm4, %v1115_v55, %v3763_v49  ;;  %v1125_v32 = vsel %vm1120_vm4, %v1116_v47, %v3767_v17  ;;  %v1144_v57 = vsel %vm1138_vm6, %v1135_v43, %v3776_v26  ;;  %v3788_v28 = vld [vmem:[#allocation82_spill] sm:$0xff]  ;;  %v3789_v49 = vld [vmem:[#allocation51_spill] sm:$0xff]  ;;  %v3795_v43 = vld [vmem:[#allocation56_spill] sm:$0xff]  ;;  %s2174_s8 = scalar_lea.vmem %s2173_s4, 2048  ;;  %p2175_p13 = scmp.lt.s32.totalorder %s3555_s11, %s2173_s4 }
 0x229   : > { %v1149_v21 = vsel %vm1147_vm7, %v1140_v35, %v3766_v5  ;;  %v1133_v24 = vsel %vm1129_vm5, %v1124_v7, %v3768_v2  ;;  %v1134_v56 = vsel %vm1129_vm5, %v1125_v32, %v3772_v62  ;;  %v1153_v42 = vsel %vm1147_vm7, %v1144_v57, %v3781_v22  ;;  %v3792_v32 = vld [vmem:[#allocation72_spill] sm:$0xff]  ;;  %v3800_v57 = vld [vmem:[#allocation69_spill] sm:$0xff]  ;;  %v3803_v22 = vld [vmem:[#allocation75_spill] sm:$0xff]  ;;  %p2176_p0 = scmp.lt.s32.totalorder %s2174_s8, %s2168_s28 }
 0x22a   : > { %v1158_v46 = vsel %vm1156_vm8, %v1149_v21, %v3770_v34  ;;  %v1142_v41 = vsel %vm1138_vm6, %v1133_v24, %v3773_v60  ;;  %v1143_v31 = vsel %vm1138_vm6, %v1134_v56, %v3777_v45  ;;  %v1159_v0 = vsel %vm1156_vm8, %v1150_v33, %v3784_v23  ;;  %v3793_v24 = vld [vmem:[#allocation73_spill] sm:$0xff]  ;;  %v3797_v60 = vld [vmem:[#allocation78_spill] sm:$0xff] }
 0x22b   : > { %v1167_v16 = vsel %vm1165_vm9, %v1158_v46, %v3774_v29  ;;  %v1151_v53 = vsel %vm1147_vm7, %v1142_v41, %v3779_v30  ;;  %v1168_v47 = vsel %vm1165_vm9, %v1159_v0, %v3787_v14  ;;  %v1152_v7 = vsel %vm1147_vm7, %v1143_v31, %v3789_v49  ;;  %v3794_v46 = vld [vmem:[#allocation55_spill] sm:$0xff]  ;;  %v3801_v31 = vld [vmem:[#allocation70_spill] sm:$0xff]  ;;  %p2177_p1 = por %p2176_p0, %p2175_p13 }
 0x22c   : > { %v1176_v51 = vsel %vm1174_vm10, %v1167_v16, %v3778_v27  ;;  %v1160_v55 = vsel %vm1156_vm8, %v1151_v53, %v3783_v39  ;;  %v1177_v52 = vsel %vm1174_vm10, %v1168_v47, %v3791_v36  ;;  %v1162_v50 = vsel %vm1156_vm8, %v1153_v42, %v3794_v46  ;;  %v3799_v16 = vld [vmem:[#allocation63_spill] sm:$0xff]  ;;  %v3802_v33 = vld [vmem:[#allocation74_spill] sm:$0xff] }
 0x22d   : > { %v1185_v8 = vsel %vm1183_vm11, %v1176_v51, %v3782_v4  ;;  %v1169_v40 = vsel %vm1165_vm9, %v1160_v55, %v3786_v61  ;;  %v1186_v15 = vsel %vm1183_vm11, %v1177_v52, %v3793_v24  ;;  %v1161_v62 = vsel %vm1156_vm8, %v1152_v7, %v3795_v43  ;;  %p2178_p2 = pnand %p2177_p1, %p2171_p12 }
 0x22e   : > { %v1194_v12 = vsel %vm1192_vm12, %v1185_v8, %v3785_v59  ;;  %v1178_v38 = vsel %vm1174_vm10, %v1169_v40, %v3790_v20  ;;  %v1195_v41 = vsel %vm1192_vm12, %v1186_v15, %v3797_v60  ;;  %v1170_v13 = vsel %vm1165_vm9, %v1161_v62, %v3799_v16  ;;  %v3804_v8 = vld [vmem:[#allocation80_spill] sm:$0xff] }
 0x22f   : > { %v1203_v35 = vsel %vm1201_vm13, %v1194_v12, %v3788_v28  ;;  %v1187_v2 = vsel %vm1183_vm11, %v1178_v38, %v3792_v32  ;;  %v1204_v26 = vsel %vm1201_vm13, %v1195_v41, %v3072_v3  ;;  %v1179_v27 = vsel %vm1174_vm10, %v1170_v13, %v3801_v31 }
 0x230   : > { %v1212_v5 = vsel %vm1210_vm14, %v1203_v35, %v3126_v58  ;;  %v3796_v58 = vld [vmem:[#allocation77_spill] sm:$0xff]  ;;  %v1213_v30 = vsel %vm1210_vm14, %v1204_v26, %v3153_v19  ;;  %v1188_v3 = vsel %vm1183_vm11, %v1179_v27, %v3803_v22 }
 0x231   : > { %v1196_v56 = vsel %vm1192_vm12, %v1187_v2, %v3796_v58  ;;  %v3805_v19 = vld [vmem:[#allocation81_spill] sm:$0xff] }
 0x232   : > { %v1205_v18 = vsel %vm1201_vm13, %v1196_v56, %v3070_v11  ;;  %v1197_v39 = vsel %vm1192_vm12, %v1188_v3, %v3805_v19 }
 0x233   : > { %v1214_v51 = vsel %vm1210_vm14, %v1205_v18, %v3151_v6  ;;  %v1206_v23 = vsel %vm1201_vm13, %v1197_v39, %v3091_v10 }
 0x234   : > { %v1215_v59 = vsel %vm1210_vm14, %v1206_v23, %v3180_v9 }
 0x28c   : > { %v1630_v21 = vpop.permute.xlu1 %1629 }
 0x28d   : > { %v1628_v17 = vpop.permute.xlu0 %1627  ;;  %v1653_v1 = vsel %vm1651_vm15, %v1212_v5, %v1630_v21 }
 0x28e   : > { %v1652_v34 = vsel %vm1651_vm15, %v3133_v37, %v1628_v17  ;;  %1662 = vst.msk [vmem:[%s3497_s9 + $0x8] sm:$0xff] %vm1660_vm0, %v1653_v1  ;;  %v3798_v37 = vld [vmem:[#allocation62_spill] sm:$0xff] }
 0x28f   : > { %1661 = vst.msk [vmem:[%s3497_s9] sm:$0xff] %vm1660_vm0, %v1652_v34  ;;  %v1171_v29 = vsel %vm1165_vm9, %v1162_v50, %v3798_v37 }
 0x290   : > { %v1180_v45 = vsel %vm1174_vm10, %v1171_v29, %v3800_v57  ;;  %v1634_v53 = vpop.permute.xlu1 %1633 }
 0x291   : > { %v1632_v54 = vpop.permute.xlu0 %1631  ;;  %v1189_v11 = vsel %vm1183_vm11, %v1180_v45, %v3802_v33  ;;  %v1655_v42 = vsel %vm1651_vm15, %v1214_v51, %v1634_v53 }
 0x292   : > { %v1654_v4 = vsel %vm1651_vm15, %v1213_v30, %v1632_v54  ;;  %v1198_v6 = vsel %vm1192_vm12, %v1189_v11, %v3804_v8  ;;  %1664 = vst.msk [vmem:[%s3497_s9 + $0x18] sm:$0xff] %vm1660_vm0, %v1655_v42 }
 0x293   : > { %1663 = vst.msk [vmem:[%s3497_s9 + $0x10] sm:$0xff] %vm1660_vm0, %v1654_v4  ;;  %v1207_v55 = vsel %vm1201_vm13, %v1198_v6, %v3089_v63 }
 0x294   : > { %v1216_v0 = vsel %vm1210_vm14, %v1207_v55, %v3178_v44  ;;  %v1638_v12 = vpop.permute.xlu1 %1637 }
 0x295   : > { %v1636_v61 = vpop.permute.xlu0 %1635  ;;  %v1657_v40 = vsel %vm1651_vm15, %v1216_v0, %v1638_v12 }
 0x296   : > { %v1656_v63 = vsel %vm1651_vm15, %v1215_v59, %v1636_v61  ;;  %1666 = vst.msk [vmem:[%s3497_s9 + $0x28] sm:$0xff] %vm1660_vm0, %v1657_v40 }
 0x297   : > { %1665 = vst.msk [vmem:[%s3497_s9 + $0x20] sm:$0xff] %vm1660_vm0, %v1656_v63 }
 0x298   : > { %v1642_v10 = vpop.permute.xlu1 %1641 }
 0x299   : > { %v1640_v44 = vpop.permute.xlu0 %1639  ;;  %v1659_v9 = vsel %vm1651_vm15, %v3201_v25, %v1642_v10 }
 0x29a   : > { %v1658_v14 = vsel %vm1651_vm15, %v3204_v48, %v1640_v44  ;;  %1668 = vst.msk [vmem:[%s3497_s9 + $0x38] sm:$0xff] %vm1660_vm0, %v1659_v9 }
 0x29b   : > { %1667 = vst.msk [vmem:[%s3497_s9 + $0x30] sm:$0xff] %vm1660_vm0, %v1658_v14 }
 0x29c   : > { %2181 = shalt.err (!%p2178_p2)
}
 0x29d   : > { %s2182_s20 = scalar_lea.hbm %s3553_s21, 1024  ;;  %s2186_s5 = scalar_lea.hbm %s3623_s3, 16384 }
 0x29e   : > { %p2183_p4 = scmp.ne.s32.totalorder %s3553_s21, %s2182_s20  ;;  %p2187_p7 = scmp.lt.u32.totalorder %s3553_s21, %s3623_s3 }
 0x29f   : > { %p2188_p9 = scmp.lt.u32.totalorder %s2186_s5, %s2182_s20  ;;  %p2190_p11 = scmp.lt.u32.totalorder %s2182_s20, %s3553_s21 }
 0x2a0   : > { %p2184_p5 = pnand %p2183_p4, %p2353_p3 }
 0x2a1   : > { %p2189_p10 = por %p2188_p9, %p2187_p7 }
 0x2a2   : > { %p2185_p6 = pneg %p2184_p5 }
 0x2a3   : > { %p2191_p12 = por %p2190_p11, %p2189_p10 }
 0x2a5   : > { %p2192_p13 = pnand %p2191_p12, %p2185_p6 }
 0x2a7   : > { %2195 = shalt.err (!%p2192_p13)
}
 0x2a8   : > { %s2281_s10 = smov 128  }
 0x2a9   : > { %2075 = dma.vmem_to_hbm [thread:$0]  (%p2353_p3), %s3555_s11, 1024, %s3553_s21, %s3567_s27, %s2281_s10, %s2281_s10, %s2265_s24  }
 0x2aa PF: > { %p2081_p0 = scmp.ge.s32.totalorder %s2262_s19, 2  ;;  %s1702_s6 = sand.u32 1, %s2234_s12  }
 0x2ab   : > { %s1703_s28 = scalar_lea.sflag [#allocation3], %s1702_s6 }
 0x2ac   : > { %p2078_p1 = pnand %p2081_p0, %p2362_p8 }
 0x2ae   : > { %2229 = dma.done.wait (!%p2078_p1), %s1703_s28, 1024  }
 0x2af   : > { %2231 = vsyncadd (!%p2078_p1), %s1703_s28, 4294966272  ;;  %s16_s19 = sadd.s32 1, %s2262_s19   ;;  %s3806_s12 = smov %s2238_s13 }
 0x2b0   : > { %p13_p2 = scmp.ge.s32.totalorder %s16_s19, 18   ;;  %s3807_s13 = smov %s2242_s14 }
 0x2b1   : > { %s3808_s14 = smov %s2371_s30  ;;  %s3809_s15 = smov %s2254_s17 }
 0x2b2   : > { %s3810_s16 = smov %s2258_s18  ;;  %s3811_s17 = smov %s3814_s22 }
 0x2b3   : > { %s3812_s18 = smov %s3818_s23  ;;  %15 = sbr.rel (!%p13_p2) target bundleno = 5 (0x5), region = 82 }
 0x2ba   :  { %1708 = vsyncpa [#allocation3], 1 }
 0x2bb   :  { %1710 = vsyncpa [#allocation3 + $0x1], 1 }

</bundles_post_ra>
